<compile_context>
chip_gen: v6e
topology: v6e:2x2x1
jax: 0.10.0
libtpu: 0.0.40
codegen_flags: <defaults>
</compile_context>

<pallas_src>
import jax
import jax.numpy as jnp
from jax import lax
from jax.experimental import pallas as pl
from jax.experimental.pallas import tpu as pltpu

EPS = 1e-5          # nn.BatchNorm2d default eps
KH = KW = 7
STRIDE = 2
PAD = 3


def _round_up(x, m):
    return (x + m - 1) // m * m


def _tpu_vmem_capacity():
    """Per-generation VMEM capacity (bytes); conservative fallback if unavailable."""
    try:
        cap = getattr(pltpu.get_tpu_info(), "vmem_capacity_bytes", None)
        if cap:
            return int(cap)
    except Exception:
        pass
    return 64 * 1024 * 1024          # v7x per-TensorCore size (safe lower bound)


def _pick_rows_per_tile(Ho, Wo, Cout, vmem_budget, tm_target):
    """Output rows per tile.  R must divide Ho (exact tiles -> exact BN statistics) and
    R*Wo must be lane-dense (multiple of 128) or the full extent, so every z / out
    block is legal and stores are unmasked.  Pick the largest tile under tm_target
    pixels whose (over-)estimated double-buffered working set fits the VMEM budget."""

    def est_bytes(r):
        tm = r * Wo
        band = (r + 4) * _round_up(Wo + 3, 16) * 128 * 2       # bf16 band, lane-padded
        z = _round_up(Cout, 16) * _round_up(tm, 128) * 2       # bf16 z tile
        out = _round_up(Cout, 8) * _round_up(tm, 128) * 4      # f32 out tile (pass 2)
        acc = _round_up(tm, 8) * 128 * 4                       # f32 accumulator
        return 2 * (band + z + out) + 2 * acc                  # double buffer + headroom

    cands = sorted(r for r in range(1, Ho + 1)
                   if Ho % r == 0 and (r == Ho or (r * Wo) % 128 == 0))
    fits = [r for r in cands if est_bytes(r) <= vmem_budget] or cands
    under = [r for r in fits if r * Wo <= tm_target]
    return max(under) if under else min(fits)


def _make_conv_stats_kernel(R, Wo, C4, Cout, Cp):
    """Pass 1: 16-tap space-to-depth conv (MXU) + per-tile BN partial stats, z written
    channel-major (NCHW-flat) in bf16 via an in-kernel XLU transpose."""
    TM = R * Wo

    def kernel(band_ref, w_ref, z_ref, sum_ref, ssq_ref):
        # band_ref: (1, R+3, Wo+3, C4) bf16   space-to-depth input band (3-row halo)
        # w_ref   : (16, C4, Cp)       bf16   4x4/s1 tap weights (Cout zero-padded to Cp)
        # z_ref   : (1, Cout, TM)      bf16   conv output tile, already channel-major
        # sum/ssq : (1, 1, Cout)       f32    per-tile batch-norm partial statistics
        acc = jnp.zeros((TM, Cp), jnp.float32)
        for ah in range(4):
            for aw in range(4):
                slab = band_ref[0, pl.ds(ah, R), pl.ds(aw, Wo), :]      # (R, Wo, C4)
                acc = acc + jnp.dot(slab.reshape(TM, C4), w_ref[ah * 4 + aw],
                                    preferred_element_type=jnp.float32)
        # Every accumulated row is a real output pixel (R divides Ho), so sums are exact
        # and no bias is added here (it cancels inside train-mode BN).
        sum_ref[...] = jnp.sum(acc, axis=0)[:Cout].reshape(1, 1, Cout)
        ssq_ref[...] = jnp.sum(acc * acc, axis=0)[:Cout].reshape(1, 1, Cout)
        # 128-lane-aligned f32 transpose (XLU), then crop to Cout and cast to bf16:
        # z leaves the kernel channel-major so the XLA epilogue transpose disappears.
        zt = jnp.transpose(acc)[:Cout, :]                               # (Cout, TM)
        z_ref[...] = zt.astype(jnp.bfloat16)[None]

    return kernel


def _bn_relu_kernel(z_ref, scale_ref, shift_ref, o_ref):
    # z_ref: (1, Cout, TM) bf16; scale/shift: (1, Cout, 1) f32; o_ref: (1, Cout, TM) f32
    z = z_ref[...].astype(jnp.float32)
    o_ref[...] = jnp.maximum(z * scale_ref[...] + shift_ref[...], 0.0)


def downsample_forward(x_nchw, weight, bias, gamma, beta, *, tm_target=None):
    """Forward pass of DownSample.  x_nchw: (N, Cin, H, W), weight: (Cout, Cin, 7, 7).
    Train-mode BatchNorm (batch statistics), matching the PyTorch module's forward."""
    N, Cin, H, W = x_nchw.shape
    Cout = weight.shape[0]
    assert weight.shape[2:] == (KH, KW)
    Ho = (H + 2 * PAD - KH) // STRIDE + 1
    Wo = (W + 2 * PAD - KW) // STRIDE + 1
    HoP, WoP = Ho + 3, Wo + 3            # tap reach: rows r+ah, cols c+aw with ah, aw < 4
    C4 = 4 * Cin                          # space-to-depth channels
    Cp = _round_up(Cout, 128)             # compute-only padding (never hits HBM tensors)
    M = N * Ho * Wo

    # ---- per-generation tiling / VMEM budget (review items 4 + 5) ----
    vmem_cap = _tpu_vmem_capacity()
    vmem_budget = max(32 * 1024 * 1024, min(int(vmem_cap * 0.7), 100 * 1024 * 1024))
    if tm_target is None:
        tm_target = 8192 if vmem_cap >= 96 * 1024 * 1024 else 4096
    R = _pick_rows_per_tile(Ho, Wo, Cout, vmem_budget, tm_target)
    n_rt = Ho // R
    TM = R * Wo
    n_tiles = N * n_rt

    # ---- glue (all O(input bytes)): NHWC + bf16 + pad + space-to-depth + row bands ----
    x = jnp.transpose(x_nchw, (0, 2, 3, 1)).astype(jnp.bfloat16)
    pad_h = 2 * HoP - (H + 2 * PAD)       # 0 or 1 (odd spatial sizes); extra zeros only
    pad_w = 2 * WoP - (W + 2 * PAD)       # ever multiply zero weights -> harmless
    xp = jnp.pad(x, ((0, 0), (PAD, PAD + pad_h), (PAD, PAD + pad_w), (0, 0)))
    # phase p = ph*2 + pw folded into channels: X_sd[n,i,j,p*Cin+c] = xp[n,2i+ph,2j+pw,c]
    x_sd = jnp.concatenate(
        [xp[:, ph::2, pw::2, :] for ph in (0, 1) for pw in (0, 1)], axis=-1
    )                                     # (N, HoP, WoP, 4*Cin)
    bands = jnp.stack([x_sd[:, i * R:i * R + R + 3] for i in range(n_rt)], axis=1)
    bands = bands.reshape(n_tiles, R + 3, WoP, C4)   # 3-row halo duplicated (~+3/R)

    # weights (Cout, Cin, 7, 7) -> 16 taps of a 4x4 conv over the 4*Cin SD channels
    w_t = jnp.transpose(weight, (2, 3, 1, 0)).astype(jnp.float32)       # (7, 7, Cin, Cout)
    w6 = jnp.zeros((4, 4, 2, 2, Cin, Cout), jnp.float32)                # (ah, aw, ph, pw, ci, co)
    for ph in (0, 1):
        for pw in (0, 1):
            sub = w_t[ph::2, pw::2]                                     # (4|3, 4|3, Cin, Cout)
            w6 = w6.at[:sub.shape[0], :sub.shape[1], ph, pw].set(sub)
    w_taps = w6.reshape(16, C4, Cout)
    w_taps = jnp.pad(w_taps, ((0, 0), (0, 0), (0, Cp - Cout))).astype(jnp.bfloat16)

    compiler_params = pltpu.CompilerParams(
        dimension_semantics=("parallel", "parallel"),
        vmem_limit_bytes=int(vmem_budget),
    )

    # ---- pass 1: conv (16 MXU taps) + per-tile channel statistics ----
    flops1 = 2 * M * 16 * C4 * Cout
    bytes1 = bands.size * 2 + w_taps.size * 2 + M * Cout * 2 + 2 * n_tiles * Cout * 4
    z, tile_sum, tile_ssq = pl.pallas_call(
        _make_conv_stats_kernel(R, Wo, C4, Cout, Cp),
        out_shape=(
            jax.ShapeDtypeStruct((N, Cout, Ho * Wo), jnp.bfloat16),
            jax.ShapeDtypeStruct((n_tiles, 1, Cout), jnp.float32),
            jax.ShapeDtypeStruct((n_tiles, 1, Cout), jnp.float32),
        ),
        grid=(N, n_rt),
        in_specs=[
            pl.BlockSpec((1, R + 3, WoP, C4), lambda n, i: (n * n_rt + i, 0, 0, 0)),
            pl.BlockSpec((16, C4, Cp), lambda n, i: (0, 0, 0)),
        ],
        out_specs=(
            pl.BlockSpec((1, Cout, TM), lambda n, i: (n, 0, i)),
            pl.BlockSpec((1, 1, Cout), lambda n, i: (n * n_rt + i, 0, 0)),
            pl.BlockSpec((1, 1, Cout), lambda n, i: (n * n_rt + i, 0, 0)),
        ),
        compiler_params=compiler_params,
        cost_estimate=pl.CostEstimate(flops=flops1, transcendentals=0,
                                      bytes_accessed=bytes1),
    )(bands, w_taps)

    # ---- tiny O(Cout) reduction + BN factor precompute (wrapper) ----
    sums = jnp.sum(tile_sum[:, 0, :], axis=0)
    sumsq = jnp.sum(tile_ssq[:, 0, :], axis=0)
    inv_m = 1.0 / float(M)
    mean = sums * inv_m
    var = jnp.maximum(sumsq * inv_m - mean * mean, 0.0)     # biased var (train-mode BN)
    inv_std = lax.rsqrt(var + EPS)
    # y = z + bias; BN(train): (y - mean_y)*inv_std*gamma + beta with mean_y = mean+bias,
    # var_y = var  ->  the conv bias cancels exactly and is intentionally unused here.
    _ = bias
    gamma_f = gamma.astype(jnp.float32)
    scale_c = gamma_f * inv_std
    shift_c = beta.astype(jnp.float32) - mean * scale_c
    scale = scale_c.reshape(1, Cout, 1)
    shift = shift_c.reshape(1, Cout, 1)

    # ---- pass 2: elementwise normalize + affine + ReLU, NCHW-flat in / out ----
    out = pl.pallas_call(
        _bn_relu_kernel,
        out_shape=jax.ShapeDtypeStruct((N, Cout, Ho * Wo), jnp.float32),
        grid=(N, n_rt),
        in_specs=[
            pl.BlockSpec((1, Cout, TM), lambda n, i: (n, 0, i)),
            pl.BlockSpec((1, Cout, 1), lambda n, i: (0, 0, 0)),
            pl.BlockSpec((1, Cout, 1), lambda n, i: (0, 0, 0)),
        ],
        out_specs=pl.BlockSpec((1, Cout, TM), lambda n, i: (n, 0, i)),
        compiler_params=compiler_params,
        cost_estimate=pl.CostEstimate(flops=3 * M * Cout, transcendentals=0,
                                      bytes_accessed=M * Cout * 6),
    )(z, scale, shift)

    return out.reshape(N, Cout, Ho, Wo)   # free reshape: layout is already NCHW


def _reference(x, weight, bias, gamma, beta):
    """Pure-JAX f32 reference (conv -> train-mode BN -> ReLU), NCHW."""
    y = lax.conv_general_dilated(
        x, weight, window_strides=(STRIDE, STRIDE), padding=((PAD, PAD), (PAD, PAD)),
        dimension_numbers=("NCHW", "OIHW", "NCHW"),
    )
    y = y + bias.reshape(1, -1, 1, 1)
    mean = jnp.mean(y, axis=(0, 2, 3), keepdims=True)
    var = jnp.mean((y - mean) ** 2, axis=(0, 2, 3), keepdims=True)
    y_hat = (y - mean) / jnp.sqrt(var + EPS)
    out = y_hat * gamma.reshape(1, -1, 1, 1) + beta.reshape(1, -1, 1, 1)
    return jnp.maximum(out, 0.0)


if __name__ == "__main__":
    N, Cin, Cout, H, W = 2, 4, 8, 16, 16

    key = jax.random.PRNGKey(0)
    k1, k2, k3, k4, k5 = jax.random.split(key, 5)
    x = jax.random.normal(k1, (N, Cin, H, W), jnp.float32)
    weight = 0.1 * jax.random.normal(k2, (Cout, Cin, 7, 7), jnp.float32)
    bias = 0.1 * jax.random.normal(k3, (Cout,), jnp.float32)
    gamma = 1.0 + 0.1 * jax.random.normal(k4, (Cout,), jnp.float32)
    beta = 0.1 * jax.random.normal(k5, (Cout,), jnp.float32)

    fwd = jax.jit(downsample_forward)
    out = jax.block_until_ready(fwd(x, weight, bias, gamma, beta))

    assert out.shape == (N, Cout, H // 2, W // 2), out.shape

    ref = _reference(x, weight, bias, gamma, beta)
    # bf16 MXU operands + bf16 z round trip (f32 accumulation / normalization).
    if not bool(jnp.allclose(out, ref, atol=3e-2, rtol=3e-2)):
        max_err = float(jnp.max(jnp.abs(out - ref)))
        raise AssertionError(f"Pallas DownSample output mismatch vs reference (max err {max_err})")

    print("KERNEL_OK")
</pallas_src>

<mosaic_0001>
module attributes {stable_mosaic.version = 11 : i64} {
  func.func @kernel(%arg0: i32, %arg1: i32, %arg2: memref<1x11x11x16xbf16, #tpu.memory_space<vmem>>, %arg3: memref<16x16x128xbf16, #tpu.memory_space<vmem>>, %arg4: memref<1x8x64xbf16, #tpu.memory_space<vmem>>, %arg5: memref<1x1x8xf32, #tpu.memory_space<vmem>>, %arg6: memref<1x1x8xf32, #tpu.memory_space<vmem>>) attributes {dimension_semantics = [#tpu.dimension_semantics<parallel>, #tpu.dimension_semantics<parallel>], iteration_bounds = array<i64: 2, 1>, scalar_prefetch = 0 : i64, scratch_operands = 0 : i64, tpu.core_type = #tpu.core_type<tc>, window_params = [{transform_indices = @transform_0, window_bounds = array<i64: 1, 11, 11, 16>}, {pipeline_mode = #tpu.pipeline_mode<synchronous>, transform_indices = @transform_1, window_bounds = array<i64: 16, 16, 128>}, {transform_indices = @transform_2, window_bounds = array<i64: 1, 8, 64>}, {transform_indices = @transform_3, window_bounds = array<i64: 1, 1, 8>}, {transform_indices = @transform_4, window_bounds = array<i64: 1, 1, 8>}]} {
    %cst = arith.constant 0.000000e+00 : f32
    %0 = vector.broadcast %cst : f32 to vector<64x128xf32>
    %c0 = arith.constant 0 : index
    %c0_0 = arith.constant 0 : index
    %c0_1 = arith.constant 0 : index
    %c0_2 = arith.constant 0 : index
    %1 = vector.load %arg2[%c0, %c0_0, %c0_1, %c0_2] : memref<1x11x11x16xbf16, #tpu.memory_space<vmem>>, vector<1x8x8x16xbf16>
    %2 = vector.shape_cast %1 : vector<1x8x8x16xbf16> to vector<8x8x16xbf16>
    %3 = vector.shape_cast %2 : vector<8x8x16xbf16> to vector<64x16xbf16>
    %c0_3 = arith.constant 0 : index
    %c0_4 = arith.constant 0 : index
    %c0_5 = arith.constant 0 : index
    %4 = vector.load %arg3[%c0_3, %c0_4, %c0_5] : memref<16x16x128xbf16, #tpu.memory_space<vmem>>, vector<1x16x128xbf16>
    %5 = vector.shape_cast %4 : vector<1x16x128xbf16> to vector<16x128xbf16>
    %cst_6 = arith.constant dense<0.000000e+00> : vector<64x128xf32>
    %6 = tpu.matmul %3, %5, %cst_6 {dimension_numbers = #tpu.dot_dimension_numbers<[1], [0], [0], [1], [0, 0, 1, 1], [], []>} : vector<64x16xbf16>, vector<16x128xbf16>, vector<64x128xf32> -> vector<64x128xf32>
    %7 = arith.addf %0, %6 : vector<64x128xf32>
    %c0_7 = arith.constant 0 : index
    %c0_8 = arith.constant 0 : index
    %c1 = arith.constant 1 : index
    %c0_9 = arith.constant 0 : index
    %8 = vector.load %arg2[%c0_7, %c0_8, %c1, %c0_9] : memref<1x11x11x16xbf16, #tpu.memory_space<vmem>>, vector<1x8x8x16xbf16>
    %9 = vector.shape_cast %8 : vector<1x8x8x16xbf16> to vector<8x8x16xbf16>
    %10 = vector.shape_cast %9 : vector<8x8x16xbf16> to vector<64x16xbf16>
    %c1_10 = arith.constant 1 : index
    %c0_11 = arith.constant 0 : index
    %c0_12 = arith.constant 0 : index
    %11 = vector.load %arg3[%c1_10, %c0_11, %c0_12] : memref<16x16x128xbf16, #tpu.memory_space<vmem>>, vector<1x16x128xbf16>
    %12 = vector.shape_cast %11 : vector<1x16x128xbf16> to vector<16x128xbf16>
    %cst_13 = arith.constant dense<0.000000e+00> : vector<64x128xf32>
    %13 = tpu.matmul %10, %12, %cst_13 {dimension_numbers = #tpu.dot_dimension_numbers<[1], [0], [0], [1], [0, 0, 1, 1], [], []>} : vector<64x16xbf16>, vector<16x128xbf16>, vector<64x128xf32> -> vector<64x128xf32>
    %14 = arith.addf %7, %13 : vector<64x128xf32>
    %c0_14 = arith.constant 0 : index
    %c0_15 = arith.constant 0 : index
    %c2 = arith.constant 2 : index
    %c0_16 = arith.constant 0 : index
    %15 = vector.load %arg2[%c0_14, %c0_15, %c2, %c0_16] : memref<1x11x11x16xbf16, #tpu.memory_space<vmem>>, vector<1x8x8x16xbf16>
    %16 = vector.shape_cast %15 : vector<1x8x8x16xbf16> to vector<8x8x16xbf16>
    %17 = vector.shape_cast %16 : vector<8x8x16xbf16> to vector<64x16xbf16>
    %c2_17 = arith.constant 2 : index
    %c0_18 = arith.constant 0 : index
    %c0_19 = arith.constant 0 : index
    %18 = vector.load %arg3[%c2_17, %c0_18, %c0_19] : memref<16x16x128xbf16, #tpu.memory_space<vmem>>, vector<1x16x128xbf16>
    %19 = vector.shape_cast %18 : vector<1x16x128xbf16> to vector<16x128xbf16>
    %cst_20 = arith.constant dense<0.000000e+00> : vector<64x128xf32>
    %20 = tpu.matmul %17, %19, %cst_20 {dimension_numbers = #tpu.dot_dimension_numbers<[1], [0], [0], [1], [0, 0, 1, 1], [], []>} : vector<64x16xbf16>, vector<16x128xbf16>, vector<64x128xf32> -> vector<64x128xf32>
    %21 = arith.addf %14, %20 : vector<64x128xf32>
    %c0_21 = arith.constant 0 : index
    %c0_22 = arith.constant 0 : index
    %c3 = arith.constant 3 : index
    %c0_23 = arith.constant 0 : index
    %22 = vector.load %arg2[%c0_21, %c0_22, %c3, %c0_23] : memref<1x11x11x16xbf16, #tpu.memory_space<vmem>>, vector<1x8x8x16xbf16>
    %23 = vector.shape_cast %22 : vector<1x8x8x16xbf16> to vector<8x8x16xbf16>
    %24 = vector.shape_cast %23 : vector<8x8x16xbf16> to vector<64x16xbf16>
    %c3_24 = arith.constant 3 : index
    %c0_25 = arith.constant 0 : index
    %c0_26 = arith.constant 0 : index
    %25 = vector.load %arg3[%c3_24, %c0_25, %c0_26] : memref<16x16x128xbf16, #tpu.memory_space<vmem>>, vector<1x16x128xbf16>
    %26 = vector.shape_cast %25 : vector<1x16x128xbf16> to vector<16x128xbf16>
    %cst_27 = arith.constant dense<0.000000e+00> : vector<64x128xf32>
    %27 = tpu.matmul %24, %26, %cst_27 {dimension_numbers = #tpu.dot_dimension_numbers<[1], [0], [0], [1], [0, 0, 1, 1], [], []>} : vector<64x16xbf16>, vector<16x128xbf16>, vector<64x128xf32> -> vector<64x128xf32>
    %28 = arith.addf %21, %27 : vector<64x128xf32>
    %c0_28 = arith.constant 0 : index
    %c1_29 = arith.constant 1 : index
    %c0_30 = arith.constant 0 : index
    %c0_31 = arith.constant 0 : index
    %29 = vector.load %arg2[%c0_28, %c1_29, %c0_30, %c0_31] : memref<1x11x11x16xbf16, #tpu.memory_space<vmem>>, vector<1x8x8x16xbf16>
    %30 = vector.shape_cast %29 : vector<1x8x8x16xbf16> to vector<8x8x16xbf16>
    %31 = vector.shape_cast %30 : vector<8x8x16xbf16> to vector<64x16xbf16>
    %c4 = arith.constant 4 : index
    %c0_32 = arith.constant 0 : index
    %c0_33 = arith.constant 0 : index
    %32 = vector.load %arg3[%c4, %c0_32, %c0_33] : memref<16x16x128xbf16, #tpu.memory_space<vmem>>, vector<1x16x128xbf16>
    %33 = vector.shape_cast %32 : vector<1x16x128xbf16> to vector<16x128xbf16>
    %cst_34 = arith.constant dense<0.000000e+00> : vector<64x128xf32>
    %34 = tpu.matmul %31, %33, %cst_34 {dimension_numbers = #tpu.dot_dimension_numbers<[1], [0], [0], [1], [0, 0, 1, 1], [], []>} : vector<64x16xbf16>, vector<16x128xbf16>, vector<64x128xf32> -> vector<64x128xf32>
    %35 = arith.addf %28, %34 : vector<64x128xf32>
    %c0_35 = arith.constant 0 : index
    %c1_36 = arith.constant 1 : index
    %c1_37 = arith.constant 1 : index
    %c0_38 = arith.constant 0 : index
    %36 = vector.load %arg2[%c0_35, %c1_36, %c1_37, %c0_38] : memref<1x11x11x16xbf16, #tpu.memory_space<vmem>>, vector<1x8x8x16xbf16>
    %37 = vector.shape_cast %36 : vector<1x8x8x16xbf16> to vector<8x8x16xbf16>
    %38 = vector.shape_cast %37 : vector<8x8x16xbf16> to vector<64x16xbf16>
    %c5 = arith.constant 5 : index
    %c0_39 = arith.constant 0 : index
    %c0_40 = arith.constant 0 : index
    %39 = vector.load %arg3[%c5, %c0_39, %c0_40] : memref<16x16x128xbf16, #tpu.memory_space<vmem>>, vector<1x16x128xbf16>
    %40 = vector.shape_cast %39 : vector<1x16x128xbf16> to vector<16x128xbf16>
    %cst_41 = arith.constant dense<0.000000e+00> : vector<64x128xf32>
    %41 = tpu.matmul %38, %40, %cst_41 {dimension_numbers = #tpu.dot_dimension_numbers<[1], [0], [0], [1], [0, 0, 1, 1], [], []>} : vector<64x16xbf16>, vector<16x128xbf16>, vector<64x128xf32> -> vector<64x128xf32>
    %42 = arith.addf %35, %41 : vector<64x128xf32>
    %c0_42 = arith.constant 0 : index
    %c1_43 = arith.constant 1 : index
    %c2_44 = arith.constant 2 : index
    %c0_45 = arith.constant 0 : index
    %43 = vector.load %arg2[%c0_42, %c1_43, %c2_44, %c0_45] : memref<1x11x11x16xbf16, #tpu.memory_space<vmem>>, vector<1x8x8x16xbf16>
    %44 = vector.shape_cast %43 : vector<1x8x8x16xbf16> to vector<8x8x16xbf16>
    %45 = vector.shape_cast %44 : vector<8x8x16xbf16> to vector<64x16xbf16>
    %c6 = arith.constant 6 : index
    %c0_46 = arith.constant 0 : index
    %c0_47 = arith.constant 0 : index
    %46 = vector.load %arg3[%c6, %c0_46, %c0_47] : memref<16x16x128xbf16, #tpu.memory_space<vmem>>, vector<1x16x128xbf16>
    %47 = vector.shape_cast %46 : vector<1x16x128xbf16> to vector<16x128xbf16>
    %cst_48 = arith.constant dense<0.000000e+00> : vector<64x128xf32>
    %48 = tpu.matmul %45, %47, %cst_48 {dimension_numbers = #tpu.dot_dimension_numbers<[1], [0], [0], [1], [0, 0, 1, 1], [], []>} : vector<64x16xbf16>, vector<16x128xbf16>, vector<64x128xf32> -> vector<64x128xf32>
    %49 = arith.addf %42, %48 : vector<64x128xf32>
    %c0_49 = arith.constant 0 : index
    %c1_50 = arith.constant 1 : index
    %c3_51 = arith.constant 3 : index
    %c0_52 = arith.constant 0 : index
    %50 = vector.load %arg2[%c0_49, %c1_50, %c3_51, %c0_52] : memref<1x11x11x16xbf16, #tpu.memory_space<vmem>>, vector<1x8x8x16xbf16>
    %51 = vector.shape_cast %50 : vector<1x8x8x16xbf16> to vector<8x8x16xbf16>
    %52 = vector.shape_cast %51 : vector<8x8x16xbf16> to vector<64x16xbf16>
    %c7 = arith.constant 7 : index
    %c0_53 = arith.constant 0 : index
    %c0_54 = arith.constant 0 : index
    %53 = vector.load %arg3[%c7, %c0_53, %c0_54] : memref<16x16x128xbf16, #tpu.memory_space<vmem>>, vector<1x16x128xbf16>
    %54 = vector.shape_cast %53 : vector<1x16x128xbf16> to vector<16x128xbf16>
    %cst_55 = arith.constant dense<0.000000e+00> : vector<64x128xf32>
    %55 = tpu.matmul %52, %54, %cst_55 {dimension_numbers = #tpu.dot_dimension_numbers<[1], [0], [0], [1], [0, 0, 1, 1], [], []>} : vector<64x16xbf16>, vector<16x128xbf16>, vector<64x128xf32> -> vector<64x128xf32>
    %56 = arith.addf %49, %55 : vector<64x128xf32>
    %c0_56 = arith.constant 0 : index
    %c2_57 = arith.constant 2 : index
    %c0_58 = arith.constant 0 : index
    %c0_59 = arith.constant 0 : index
    %57 = vector.load %arg2[%c0_56, %c2_57, %c0_58, %c0_59] : memref<1x11x11x16xbf16, #tpu.memory_space<vmem>>, vector<1x8x8x16xbf16>
    %58 = vector.shape_cast %57 : vector<1x8x8x16xbf16> to vector<8x8x16xbf16>
    %59 = vector.shape_cast %58 : vector<8x8x16xbf16> to vector<64x16xbf16>
    %c8 = arith.constant 8 : index
    %c0_60 = arith.constant 0 : index
    %c0_61 = arith.constant 0 : index
    %60 = vector.load %arg3[%c8, %c0_60, %c0_61] : memref<16x16x128xbf16, #tpu.memory_space<vmem>>, vector<1x16x128xbf16>
    %61 = vector.shape_cast %60 : vector<1x16x128xbf16> to vector<16x128xbf16>
    %cst_62 = arith.constant dense<0.000000e+00> : vector<64x128xf32>
    %62 = tpu.matmul %59, %61, %cst_62 {dimension_numbers = #tpu.dot_dimension_numbers<[1], [0], [0], [1], [0, 0, 1, 1], [], []>} : vector<64x16xbf16>, vector<16x128xbf16>, vector<64x128xf32> -> vector<64x128xf32>
    %63 = arith.addf %56, %62 : vector<64x128xf32>
    %c0_63 = arith.constant 0 : index
    %c2_64 = arith.constant 2 : index
    %c1_65 = arith.constant 1 : index
    %c0_66 = arith.constant 0 : index
    %64 = vector.load %arg2[%c0_63, %c2_64, %c1_65, %c0_66] : memref<1x11x11x16xbf16, #tpu.memory_space<vmem>>, vector<1x8x8x16xbf16>
    %65 = vector.shape_cast %64 : vector<1x8x8x16xbf16> to vector<8x8x16xbf16>
    %66 = vector.shape_cast %65 : vector<8x8x16xbf16> to vector<64x16xbf16>
    %c9 = arith.constant 9 : index
    %c0_67 = arith.constant 0 : index
    %c0_68 = arith.constant 0 : index
    %67 = vector.load %arg3[%c9, %c0_67, %c0_68] : memref<16x16x128xbf16, #tpu.memory_space<vmem>>, vector<1x16x128xbf16>
    %68 = vector.shape_cast %67 : vector<1x16x128xbf16> to vector<16x128xbf16>
    %cst_69 = arith.constant dense<0.000000e+00> : vector<64x128xf32>
    %69 = tpu.matmul %66, %68, %cst_69 {dimension_numbers = #tpu.dot_dimension_numbers<[1], [0], [0], [1], [0, 0, 1, 1], [], []>} : vector<64x16xbf16>, vector<16x128xbf16>, vector<64x128xf32> -> vector<64x128xf32>
    %70 = arith.addf %63, %69 : vector<64x128xf32>
    %c0_70 = arith.constant 0 : index
    %c2_71 = arith.constant 2 : index
    %c2_72 = arith.constant 2 : index
    %c0_73 = arith.constant 0 : index
    %71 = vector.load %arg2[%c0_70, %c2_71, %c2_72, %c0_73] : memref<1x11x11x16xbf16, #tpu.memory_space<vmem>>, vector<1x8x8x16xbf16>
    %72 = vector.shape_cast %71 : vector<1x8x8x16xbf16> to vector<8x8x16xbf16>
    %73 = vector.shape_cast %72 : vector<8x8x16xbf16> to vector<64x16xbf16>
    %c10 = arith.constant 10 : index
    %c0_74 = arith.constant 0 : index
    %c0_75 = arith.constant 0 : index
    %74 = vector.load %arg3[%c10, %c0_74, %c0_75] : memref<16x16x128xbf16, #tpu.memory_space<vmem>>, vector<1x16x128xbf16>
    %75 = vector.shape_cast %74 : vector<1x16x128xbf16> to vector<16x128xbf16>
    %cst_76 = arith.constant dense<0.000000e+00> : vector<64x128xf32>
    %76 = tpu.matmul %73, %75, %cst_76 {dimension_numbers = #tpu.dot_dimension_numbers<[1], [0], [0], [1], [0, 0, 1, 1], [], []>} : vector<64x16xbf16>, vector<16x128xbf16>, vector<64x128xf32> -> vector<64x128xf32>
    %77 = arith.addf %70, %76 : vector<64x128xf32>
    %c0_77 = arith.constant 0 : index
    %c2_78 = arith.constant 2 : index
    %c3_79 = arith.constant 3 : index
    %c0_80 = arith.constant 0 : index
    %78 = vector.load %arg2[%c0_77, %c2_78, %c3_79, %c0_80] : memref<1x11x11x16xbf16, #tpu.memory_space<vmem>>, vector<1x8x8x16xbf16>
    %79 = vector.shape_cast %78 : vector<1x8x8x16xbf16> to vector<8x8x16xbf16>
    %80 = vector.shape_cast %79 : vector<8x8x16xbf16> to vector<64x16xbf16>
    %c11 = arith.constant 11 : index
    %c0_81 = arith.constant 0 : index
    %c0_82 = arith.constant 0 : index
    %81 = vector.load %arg3[%c11, %c0_81, %c0_82] : memref<16x16x128xbf16, #tpu.memory_space<vmem>>, vector<1x16x128xbf16>
    %82 = vector.shape_cast %81 : vector<1x16x128xbf16> to vector<16x128xbf16>
    %cst_83 = arith.constant dense<0.000000e+00> : vector<64x128xf32>
    %83 = tpu.matmul %80, %82, %cst_83 {dimension_numbers = #tpu.dot_dimension_numbers<[1], [0], [0], [1], [0, 0, 1, 1], [], []>} : vector<64x16xbf16>, vector<16x128xbf16>, vector<64x128xf32> -> vector<64x128xf32>
    %84 = arith.addf %77, %83 : vector<64x128xf32>
    %c0_84 = arith.constant 0 : index
    %c3_85 = arith.constant 3 : index
    %c0_86 = arith.constant 0 : index
    %c0_87 = arith.constant 0 : index
    %85 = vector.load %arg2[%c0_84, %c3_85, %c0_86, %c0_87] : memref<1x11x11x16xbf16, #tpu.memory_space<vmem>>, vector<1x8x8x16xbf16>
    %86 = vector.shape_cast %85 : vector<1x8x8x16xbf16> to vector<8x8x16xbf16>
    %87 = vector.shape_cast %86 : vector<8x8x16xbf16> to vector<64x16xbf16>
    %c12 = arith.constant 12 : index
    %c0_88 = arith.constant 0 : index
    %c0_89 = arith.constant 0 : index
    %88 = vector.load %arg3[%c12, %c0_88, %c0_89] : memref<16x16x128xbf16, #tpu.memory_space<vmem>>, vector<1x16x128xbf16>
    %89 = vector.shape_cast %88 : vector<1x16x128xbf16> to vector<16x128xbf16>
    %cst_90 = arith.constant dense<0.000000e+00> : vector<64x128xf32>
    %90 = tpu.matmul %87, %89, %cst_90 {dimension_numbers = #tpu.dot_dimension_numbers<[1], [0], [0], [1], [0, 0, 1, 1], [], []>} : vector<64x16xbf16>, vector<16x128xbf16>, vector<64x128xf32> -> vector<64x128xf32>
    %91 = arith.addf %84, %90 : vector<64x128xf32>
    %c0_91 = arith.constant 0 : index
    %c3_92 = arith.constant 3 : index
    %c1_93 = arith.constant 1 : index
    %c0_94 = arith.constant 0 : index
    %92 = vector.load %arg2[%c0_91, %c3_92, %c1_93, %c0_94] : memref<1x11x11x16xbf16, #tpu.memory_space<vmem>>, vector<1x8x8x16xbf16>
    %93 = vector.shape_cast %92 : vector<1x8x8x16xbf16> to vector<8x8x16xbf16>
    %94 = vector.shape_cast %93 : vector<8x8x16xbf16> to vector<64x16xbf16>
    %c13 = arith.constant 13 : index
    %c0_95 = arith.constant 0 : index
    %c0_96 = arith.constant 0 : index
    %95 = vector.load %arg3[%c13, %c0_95, %c0_96] : memref<16x16x128xbf16, #tpu.memory_space<vmem>>, vector<1x16x128xbf16>
    %96 = vector.shape_cast %95 : vector<1x16x128xbf16> to vector<16x128xbf16>
    %cst_97 = arith.constant dense<0.000000e+00> : vector<64x128xf32>
    %97 = tpu.matmul %94, %96, %cst_97 {dimension_numbers = #tpu.dot_dimension_numbers<[1], [0], [0], [1], [0, 0, 1, 1], [], []>} : vector<64x16xbf16>, vector<16x128xbf16>, vector<64x128xf32> -> vector<64x128xf32>
    %98 = arith.addf %91, %97 : vector<64x128xf32>
    %c0_98 = arith.constant 0 : index
    %c3_99 = arith.constant 3 : index
    %c2_100 = arith.constant 2 : index
    %c0_101 = arith.constant 0 : index
    %99 = vector.load %arg2[%c0_98, %c3_99, %c2_100, %c0_101] : memref<1x11x11x16xbf16, #tpu.memory_space<vmem>>, vector<1x8x8x16xbf16>
    %100 = vector.shape_cast %99 : vector<1x8x8x16xbf16> to vector<8x8x16xbf16>
    %101 = vector.shape_cast %100 : vector<8x8x16xbf16> to vector<64x16xbf16>
    %c14 = arith.constant 14 : index
    %c0_102 = arith.constant 0 : index
    %c0_103 = arith.constant 0 : index
    %102 = vector.load %arg3[%c14, %c0_102, %c0_103] : memref<16x16x128xbf16, #tpu.memory_space<vmem>>, vector<1x16x128xbf16>
    %103 = vector.shape_cast %102 : vector<1x16x128xbf16> to vector<16x128xbf16>
    %cst_104 = arith.constant dense<0.000000e+00> : vector<64x128xf32>
    %104 = tpu.matmul %101, %103, %cst_104 {dimension_numbers = #tpu.dot_dimension_numbers<[1], [0], [0], [1], [0, 0, 1, 1], [], []>} : vector<64x16xbf16>, vector<16x128xbf16>, vector<64x128xf32> -> vector<64x128xf32>
    %105 = arith.addf %98, %104 : vector<64x128xf32>
    %c0_105 = arith.constant 0 : index
    %c3_106 = arith.constant 3 : index
    %c3_107 = arith.constant 3 : index
    %c0_108 = arith.constant 0 : index
    %106 = vector.load %arg2[%c0_105, %c3_106, %c3_107, %c0_108] : memref<1x11x11x16xbf16, #tpu.memory_space<vmem>>, vector<1x8x8x16xbf16>
    %107 = vector.shape_cast %106 : vector<1x8x8x16xbf16> to vector<8x8x16xbf16>
    %108 = vector.shape_cast %107 : vector<8x8x16xbf16> to vector<64x16xbf16>
    %c15 = arith.constant 15 : index
    %c0_109 = arith.constant 0 : index
    %c0_110 = arith.constant 0 : index
    %109 = vector.load %arg3[%c15, %c0_109, %c0_110] : memref<16x16x128xbf16, #tpu.memory_space<vmem>>, vector<1x16x128xbf16>
    %110 = vector.shape_cast %109 : vector<1x16x128xbf16> to vector<16x128xbf16>
    %cst_111 = arith.constant dense<0.000000e+00> : vector<64x128xf32>
    %111 = tpu.matmul %108, %110, %cst_111 {dimension_numbers = #tpu.dot_dimension_numbers<[1], [0], [0], [1], [0, 0, 1, 1], [], []>} : vector<64x16xbf16>, vector<16x128xbf16>, vector<64x128xf32> -> vector<64x128xf32>
    %112 = arith.addf %105, %111 : vector<64x128xf32>
    %cst_112 = arith.constant dense<0.000000e+00> : vector<128xf32>
    %113 = vector.multi_reduction <add>, %112, %cst_112 [0] : vector<64x128xf32> to vector<128xf32>
    %114 = vector.extract_strided_slice %113 {offsets = [0], sizes = [8], strides = [1]} : vector<128xf32> to vector<8xf32>
    %115 = vector.shape_cast %114 : vector<8xf32> to vector<1x1x8xf32>
    %c0_113 = arith.constant 0 : index
    %c0_114 = arith.constant 0 : index
    %c0_115 = arith.constant 0 : index
    %116 = vector.load %arg5[%c0_113, %c0_114, %c0_115] : memref<1x1x8xf32, #tpu.memory_space<vmem>>, vector<1x1x8xf32>
    tpu.vector_store %arg5[%c0_113, %c0_114, %c0_115], %115 {strides = array<i32>} : memref<1x1x8xf32, #tpu.memory_space<vmem>>, vector<1x1x8xf32>,
    %117 = arith.mulf %112, %112 : vector<64x128xf32>
    %cst_116 = arith.constant dense<0.000000e+00> : vector<128xf32>
    %118 = vector.multi_reduction <add>, %117, %cst_116 [0] : vector<64x128xf32> to vector<128xf32>
    %119 = vector.extract_strided_slice %118 {offsets = [0], sizes = [8], strides = [1]} : vector<128xf32> to vector<8xf32>
    %120 = vector.shape_cast %119 : vector<8xf32> to vector<1x1x8xf32>
    %c0_117 = arith.constant 0 : index
    %c0_118 = arith.constant 0 : index
    %c0_119 = arith.constant 0 : index
    %121 = vector.load %arg6[%c0_117, %c0_118, %c0_119] : memref<1x1x8xf32, #tpu.memory_space<vmem>>, vector<1x1x8xf32>
    tpu.vector_store %arg6[%c0_117, %c0_118, %c0_119], %120 {strides = array<i32>} : memref<1x1x8xf32, #tpu.memory_space<vmem>>, vector<1x1x8xf32>,
    %122 = tpu.transpose %112, [1, 0] : vector<64x128xf32> -> vector<128x64xf32>
    %123 = vector.extract_strided_slice %122 {offsets = [0, 0], sizes = [8, 64], strides = [1, 1]} : vector<128x64xf32> to vector<8x64xf32>
    %124 = arith.truncf %123 : vector<8x64xf32> to vector<8x64xbf16>
    %125 = vector.shape_cast %124 : vector<8x64xbf16> to vector<1x8x64xbf16>
    %c0_120 = arith.constant 0 : index
    %c0_121 = arith.constant 0 : index
    %c0_122 = arith.constant 0 : index
    %126 = vector.load %arg4[%c0_120, %c0_121, %c0_122] : memref<1x8x64xbf16, #tpu.memory_space<vmem>>, vector<1x8x64xbf16>
    tpu.vector_store %arg4[%c0_120, %c0_121, %c0_122], %125 {strides = array<i32>} : memref<1x8x64xbf16, #tpu.memory_space<vmem>>, vector<1x8x64xbf16>,
    return
  }
  func.func @transform_0(%arg0: i32, %arg1: i32) -> (i32, i32, i32, i32) {
    %c1_i32 = arith.constant 1 : i32
    %0 = arith.muli %arg0, %c1_i32 : i32
    %1 = arith.addi %0, %arg1 : i32
    %c0_i32 = arith.constant 0 : i32
    %c0_i32_0 = arith.constant 0 : i32
    %c0_i32_1 = arith.constant 0 : i32
    %c0_i32_2 = arith.constant 0 : i32
    return %1, %c0_i32, %c0_i32_0, %c0_i32_1 : i32, i32, i32, i32
  }
  func.func @transform_1(%arg0: i32, %arg1: i32) -> (i32, i32, i32) {
    %c0_i32 = arith.constant 0 : i32
    %c0_i32_0 = arith.constant 0 : i32
    %c0_i32_1 = arith.constant 0 : i32
    %c0_i32_2 = arith.constant 0 : i32
    return %c0_i32, %c0_i32_0, %c0_i32_1 : i32, i32, i32
  }
  func.func @transform_2(%arg0: i32, %arg1: i32) -> (i32, i32, i32) {
    %c0_i32 = arith.constant 0 : i32
    %c0_i32_0 = arith.constant 0 : i32
    return %arg0, %c0_i32, %arg1 : i32, i32, i32
  }
  func.func @transform_3(%arg0: i32, %arg1: i32) -> (i32, i32, i32) {
    %c1_i32 = arith.constant 1 : i32
    %0 = arith.muli %arg0, %c1_i32 : i32
    %1 = arith.addi %0, %arg1 : i32
    %c0_i32 = arith.constant 0 : i32
    %c0_i32_0 = arith.constant 0 : i32
    %c0_i32_1 = arith.constant 0 : i32
    return %1, %c0_i32, %c0_i32_0 : i32, i32, i32
  }
  func.func @transform_4(%arg0: i32, %arg1: i32) -> (i32, i32, i32) {
    %c1_i32 = arith.constant 1 : i32
    %0 = arith.muli %arg0, %c1_i32 : i32
    %1 = arith.addi %0, %arg1 : i32
    %c0_i32 = arith.constant 0 : i32
    %c0_i32_0 = arith.constant 0 : i32
    %c0_i32_1 = arith.constant 0 : i32
    return %1, %c0_i32, %c0_i32_0 : i32, i32, i32
  }
}

module attributes {stable_mosaic.version = 11 : i64} {
  func.func @_bn_relu_kernel(%arg0: i32, %arg1: i32, %arg2: memref<1x8x64xbf16, #tpu.memory_space<vmem>>, %arg3: memref<1x8x1xf32, #tpu.memory_space<vmem>>, %arg4: memref<1x8x1xf32, #tpu.memory_space<vmem>>, %arg5: memref<1x8x64xf32, #tpu.memory_space<vmem>>) attributes {dimension_semantics = [#tpu.dimension_semantics<parallel>, #tpu.dimension_semantics<parallel>], iteration_bounds = array<i64: 2, 1>, scalar_prefetch = 0 : i64, scratch_operands = 0 : i64, tpu.core_type = #tpu.core_type<tc>, window_params = [{transform_indices = @transform_0, window_bounds = array<i64: 1, 8, 64>}, {pipeline_mode = #tpu.pipeline_mode<synchronous>, transform_indices = @transform_1, window_bounds = array<i64: 1, 8, 1>}, {pipeline_mode = #tpu.pipeline_mode<synchronous>, transform_indices = @transform_2, window_bounds = array<i64: 1, 8, 1>}, {transform_indices = @transform_3, window_bounds = array<i64: 1, 8, 64>}]} {
    %c0 = arith.constant 0 : index
    %c0_0 = arith.constant 0 : index
    %c0_1 = arith.constant 0 : index
    %0 = vector.load %arg2[%c0, %c0_0, %c0_1] : memref<1x8x64xbf16, #tpu.memory_space<vmem>>, vector<1x8x64xbf16>
    %1 = arith.extf %0 : vector<1x8x64xbf16> to vector<1x8x64xf32>
    %c0_2 = arith.constant 0 : index
    %c0_3 = arith.constant 0 : index
    %c0_4 = arith.constant 0 : index
    %2 = vector.load %arg3[%c0_2, %c0_3, %c0_4] : memref<1x8x1xf32, #tpu.memory_space<vmem>>, vector<1x8x1xf32>
    %3 = vector.broadcast %2 : vector<1x8x1xf32> to vector<1x8x64xf32>
    %4 = arith.mulf %1, %3 : vector<1x8x64xf32>
    %c0_5 = arith.constant 0 : index
    %c0_6 = arith.constant 0 : index
    %c0_7 = arith.constant 0 : index
    %5 = vector.load %arg4[%c0_5, %c0_6, %c0_7] : memref<1x8x1xf32, #tpu.memory_space<vmem>>, vector<1x8x1xf32>
    %6 = vector.broadcast %5 : vector<1x8x1xf32> to vector<1x8x64xf32>
    %7 = arith.addf %4, %6 : vector<1x8x64xf32>
    %cst = arith.constant 0.000000e+00 : f32
    %8 = vector.broadcast %cst : f32 to vector<1x8x64xf32>
    %9 = arith.maximumf %7, %8 : vector<1x8x64xf32>
    %c0_8 = arith.constant 0 : index
    %c0_9 = arith.constant 0 : index
    %c0_10 = arith.constant 0 : index
    %10 = vector.load %arg5[%c0_8, %c0_9, %c0_10] : memref<1x8x64xf32, #tpu.memory_space<vmem>>, vector<1x8x64xf32>
    tpu.vector_store %arg5[%c0_8, %c0_9, %c0_10], %9 {strides = array<i32>} : memref<1x8x64xf32, #tpu.memory_space<vmem>>, vector<1x8x64xf32>,
    return
  }
  func.func @transform_0(%arg0: i32, %arg1: i32) -> (i32, i32, i32) {
    %c0_i32 = arith.constant 0 : i32
    %c0_i32_0 = arith.constant 0 : i32
    return %arg0, %c0_i32, %arg1 : i32, i32, i32
  }
  func.func @transform_1(%arg0: i32, %arg1: i32) -> (i32, i32, i32) {
    %c0_i32 = arith.constant 0 : i32
    %c0_i32_0 = arith.constant 0 : i32
    %c0_i32_1 = arith.constant 0 : i32
    %c0_i32_2 = arith.constant 0 : i32
    return %c0_i32, %c0_i32_0, %c0_i32_1 : i32, i32, i32
  }
  func.func @transform_2(%arg0: i32, %arg1: i32) -> (i32, i32, i32) {
    %c0_i32 = arith.constant 0 : i32
    %c0_i32_0 = arith.constant 0 : i32
    %c0_i32_1 = arith.constant 0 : i32
    %c0_i32_2 = arith.constant 0 : i32
    return %c0_i32, %c0_i32_0, %c0_i32_1 : i32, i32, i32
  }
  func.func @transform_3(%arg0: i32, %arg1: i32) -> (i32, i32, i32) {
    %c0_i32 = arith.constant 0 : i32
    %c0_i32_0 = arith.constant 0 : i32
    return %arg0, %c0_i32, %arg1 : i32, i32, i32
  }
}

</mosaic_0001>

<bundles_post_ra>
// kernel: downsample_forward.3
= control target key start
LH: loop header
LB: loop body
LE: loop exit
PB: predicated region body
PF: predicated region fallthrough
CT: control target
= control target key end

     0   :  { %s370_s12 = smov 0   ;;  %s372_s13 = smov 0   ;;  %s406_s0 = inlined_call_operand.vmem [shape: bf16[2,8,64], index: 0, kind: input, shape index: {}]   ;;  %s407_s1 = inlined_call_operand.vmem [shape: f32[1,8,1], index: 1, kind: input, shape index: {}]   ;;  %s408_s2 = inlined_call_operand.vmem [shape: f32[1,8,1], index: 2, kind: input, shape index: {}]   ;;  %s409_s3 = inlined_call_operand.vmem [shape: f32[2,8,64], index: 3, kind: output, shape index: {}]  }
   0x1   :  { %s374_s14 = smov 0  }
   0x2 LB: > { %s25_s15 = sadd.s32 1, %s343_s13  ;;  %p294_p0 = scmp.ge.s32.totalorder %s347_s14, 1  ;;  %s347_s14 = sphi %s374_s14, %s13_s14   ;;  %s343_s13 = sphi %s372_s13, %s411_s13   ;;  %s339_s12 = sphi %s370_s12, %s410_s12  }
   0x3   : > { %p27_p1 = scmp.ge.s32.totalorder %s25_s15, 2  ;;  %p155_p2 = scmp.lt.s32.totalorder %s347_s14, 3 }
   0x5   : > { %s413_s15 = smov (%p27_p1, %s25_s15), 0  ;;  %p156_p3 = pnand %p294_p0, %p155_p2 }
   0x6   : > { %p183_p4 = scmp.lt.s32.totalorder (!%p156_p3), %s339_s12, 1 }
   0x7   : > { %159 = sbr.rel (%p156_p3) target bundleno = 147 (0x93), region = 32 }
   0xc   : > { %v199_v0 = vld [vmem:[%s407_s1] sm:$0xff]  ;;  %v349_v1 = vmov 0   ;;  %s415_s12 = smov (!%p183_p4, %s339_s12), 1  ;;  %vm214_vm0 = vcmask 523264  }
   0xd   : > { %324 = vset.pattern.permute.xlu0 %v349_v1  ;;  %v206_v2 = vld [vmem:[%s408_s2] sm:$0xff]  ;;  %s295_s20 = sshll.u32 %s415_s12, 2  ;;  %s296_s24 = sshll.u32 %s415_s12, 3 }
   0xe   : > { %202 = vperm.xlu0 %324, %v199_v0   ;;  %s189_s23 = scalar_lea.vmem %s406_s0, %s295_s20  ;;  %s196_s27 = scalar_lea.vmem %s409_s3, %s296_s24 }
   0xf   : > { %v197_v3 = vld [vmem:[%s189_s23] sm:$0xf] }
  0x10   : > { %v198_v4 = vunpack.c.l.bf16 %v197_v3 }
  0x12   : > { %209 = vperm.xlu0 %324, %v206_v2  }
  0x89   : > { %v203_v5 = vpop.permute.xlu0 %202 }
  0x8a   : > { %v205_v6 = vmul.f32 %v203_v5, %v198_v4 }
  0x8d   : > { %v210_v7 = vpop.permute.xlu0 %209 }
  0x8e   : > { %v212_v8 = vadd.f32 %v210_v7, %v205_v6 }
  0x90   : > { %v213_v9 = vmax.f32 %v212_v8, 0.0 }
  0x92   : > { %215 = vst.msk [vmem:[%s196_s27] sm:$0xff] %vm214_vm0, %v213_v9 }
  0x93 PF: > { %s13_s14 = sadd.s32 1, %s347_s14   ;;  %s410_s12 = smov %s343_s13 }
  0x94   : > { %p10_p5 = scmp.ge.s32.totalorder %s13_s14, 4   ;;  %s411_s13 = smov %s413_s15 }
  0x96   :  { %12 = sbr.rel (!%p10_p5) target bundleno = 2 (0x2), region = 62 }

// kernel: downsample_forward.2
= control target key start
LH: loop header
LB: loop body
LE: loop exit
PB: predicated region body
PF: predicated region fallthrough
CT: control target
= control target key end

     0   :  { %s4225_s15 = smov 0   ;;  %s4227_s16 = smov 0   ;;  %s5195_s0 = inlined_call_operand.vmem [shape: bf16[2,11,11,16], index: 0, kind: input, shape index: {}]   ;;  %s5196_s1 = inlined_call_operand.vmem [shape: bf16[16,16,128], index: 1, kind: input, shape index: {}]   ;;  %s5197_s2 = inlined_call_operand.vmem [shape: bf16[2,8,64], index: 2, kind: output, shape index: {0}]   ;;  %s5198_s3 = inlined_call_operand.vmem [shape: f32[2,1,8], index: 3, kind: output, shape index: {1}]   ;;  %s5199_s4 = inlined_call_operand.vmem [shape: f32[2,1,8], index: 4, kind: output, shape index: {2}]  }
   0x1   :  { %s4229_s17 = smov 0  }
   0x2 LB: > { %s27_s18 = sadd.s32 1, %s4194_s16  ;;  %p3547_p0 = scmp.ge.s32.totalorder %s4198_s17, 1  ;;  %s4198_s17 = sphi %s4229_s17, %s15_s17   ;;  %s4194_s16 = sphi %s4227_s16, %s5227_s16   ;;  %s4190_s15 = sphi %s4225_s15, %s5226_s15  }
   0x3   : > { %p29_p1 = scmp.ge.s32.totalorder %s27_s18, 2  ;;  %p189_p2 = scmp.lt.s32.totalorder %s4198_s17, 3 }
   0x5   : > { %s5229_s18 = smov (%p29_p1, %s27_s18), 0  ;;  %p190_p3 = pnand %p3547_p0, %p189_p2 }
   0x7   : > { %193 = sbr.rel (%p190_p3) target bundleno = 539 (0x21b), region = 28 }
   0xc   : > { %v4144_v0 = vld [vmem:[%s5196_s1] sm:$0xff]   ;;  %p227_p4 = scmp.lt.s32.totalorder %s4190_s15, 1  ;;  %v4145_v1 = vld [vmem:[%s5196_s1 + $0x8] sm:$0xff]   ;;  %v4254_v2 = vld [vmem:[%s5196_s1 + $0x10] sm:$0xff]   ;;  %vm269_vm0 = vsmask.f32 3328 }
   0xd   : > { %3968 = vmatprep.subr.bf16.mxu1 %v4144_v0  ;;  %3958 = vmatprep.subr.bf16.mxu0 %v4145_v1  ;;  %v4149_v3 = vld [vmem:[%s5196_s1 + $0x18] sm:$0xff]   ;;  %vm405_vm1 = vcmask 130048   ;;  %vm270_vm2 = vsmask.f32 7440  ;;  %v4287_v32 = vld [vmem:[%s5196_s1 + $0x28] sm:$0xff]   ;;  %vm610_vm6 = vcmask 1042432  }
   0xe   : > { %s5231_s15 = smov (!%p227_p4, %s4190_s15), 1  ;;  %3969 = vmatpush3.bf16.msra.mxu1 %v4144_v0  ;;  %3959 = vmatpush3.bf16.msra.mxu0 %v4145_v1  ;;  %vm4291_vm3 = vmor %vm269_vm0, %vm270_vm2  ;;  %vm759_vm4 = vsmask.f32 2304  ;;  %vm760_vm5 = vsmask.f32 6416  ;;  %vm611_vm7 = vcmask 1046532  }
   0xf   : > { %s4118_s25 = smul.u32 88, %s5231_s15  ;;  %3978 = vmatprep.subr.bf16.mxu0 %v4254_v2  ;;  %3988 = vmatprep.subr.bf16.mxu1 %v4149_v3  ;;  %vm4370_vm8 = vmor %vm759_vm4, %vm760_vm5  ;;  %s243_s9 = scalar_lea.vmem %s5198_s3, %s5231_s15  ;;  %vm3356_vm10 = vcmask 57344   ;;  %vm3413_vm11 = vcmask 519168  }
  0x10   : > { %vm4383_vm9 = vmor %vm610_vm6, %vm611_vm7  ;;  %s248_s12 = scalar_lea.vmem %s5199_s4, %s5231_s15  ;;  %s3549_s13 = sshll.u32 %s5231_s15, 2 }
  0x11   : > { %s4264_s30 = scalar_lea.vmem %s5195_s0, %s4118_s25  ;;  %s239_s20 = scalar_lea.vmem %s5197_s2, %s3549_s13 }
  0x12   : > { %v251_v4 = vld [vmem:[%s4264_s30] sm:$0xf]  ;;  %v252_v5 = vld [vmem:[%s4264_s30 + $0x8] sm:$0xf]  ;;  %v253_v6 = vld [vmem:[%s4264_s30 + $0x10] sm:$0xf] }
  0x13   : > { %v273_v7 = vshrl.u32 %v251_v4, 16  ;;  %v276_v8 = vshll.u32 %v251_v4, 16  ;;  %v287_v9 = vshrl.u32 %v252_v5, 16  ;;  %v290_v10 = vshll.u32 %v252_v5, 16  ;;  %v254_v11 = vld [vmem:[%s4264_s30 + $0x18] sm:$0xf] }
  0x14   : > { %v3561_v12 = vcombine.low %v251_v4, %v252_v5  ;;  %v301_v13 = vshrl.u32 %v253_v6, 16  ;;  %v304_v14 = vshll.u32 %v253_v6, 16  ;;  %v315_v15 = vshrl.u32 %v254_v11, 16  ;;  %v4271_v16 = vld [vmem:[%s4264_s30 + $0x4] sm:$0x1] }
  0x15   : > { %v275_v17 = vrot.slane %v273_v7, 4  ;;  %v278_v18 = vrot.slane %v276_v8, 5  ;;  %v289_v19 = vrot.slane %v287_v9, 4  ;;  %v292_v20 = vrot.slane %v290_v10, 5  ;;  %v4274_v21 = vld [vmem:[%s4264_s30 + $0xc] sm:$0x1] }
  0x16   : > { %3970 = vmatprep.mubr.msk.bf16.mxu1 %vm405_vm1, %v3561_v12  ;;  %v303_v22 = vrot.slane %v301_v13, 4  ;;  %v306_v23 = vrot.slane %v304_v14, 5  ;;  %v317_v24 = vrot.slane %v315_v15, 4  ;;  %v318_v25 = vshll.u32 %v254_v11, 16  ;;  %v4279_v30 = vld [vmem:[%s4264_s30 + $0x14] sm:$0x1] }
  0x17   : > { %v3562_v26 = vcombine.low %v253_v6, %v254_v11  ;;  %v279_v27 = vor.u32 %v278_v18, %v275_v17  ;;  %v282_v28 = vshll.u32 %v4271_v16, 16  ;;  %v293_v29 = vor.u32 %v292_v20, %v289_v19  ;;  %v4282_v31 = vld [vmem:[%s4264_s30 + $0x1c] sm:$0x1]  ;;  %v255_v42 = vld [vmem:[%s4264_s30 + $0x20] sm:$0xf] }
  0x18   : > { %v320_v33 = vrot.slane %v318_v25, 5  ;;  %v296_v35 = vshll.u32 %v4274_v21, 16  ;;  %v615_v36 = vrot.slane %v4271_v16, 5  ;;  %v619_v37 = vrot.slane %v4274_v21, 5  ;;  %v256_v47 = vld [vmem:[%s4264_s30 + $0x28] sm:$0xf] }
  0x19   : > { %3971 = vmatmul.mubr.msk.bf16.vlgmr.msra.gmra.mxu1 %vm405_vm1, %v3562_v26  ;;  %v280_v38 = vrot.slane %v279_v27, 4  ;;  %v284_v39 = vrot.slane %v282_v28, 5  ;;  %v294_v40 = vrot.slane %v293_v29, 4  ;;  %v307_v41 = vor.u32 %v306_v23, %v303_v22  ;;  %v257_v56 = vld [vmem:[%s4264_s30 + $0x30] sm:$0xf]  ;;  %v4323_v8 = vld [vmem:[%s5196_s1 + $0x20] sm:$0xff]  }
  0x1a   : > { %v298_v43 = vrot.slane %v296_v35, 5  ;;  %v310_v44 = vshll.u32 %v4279_v30, 16  ;;  %v321_v45 = vor.u32 %v320_v33, %v317_v24  ;;  %v324_v46 = vshll.u32 %v4282_v31, 16  ;;  %3989 = vmatpush3.bf16.msra.mxu1 %v4149_v3  ;;  %v258_v61 = vld [vmem:[%s4264_s30 + $0x38] sm:$0xf]  ;;  %v4424_v21 = vld [vmem:[%s5196_s1 + $0x30] sm:$0xff]  }
  0x1b   : > { %v285_v48 = vsel %vm4291_vm3, %v280_v38, %v284_v39  ;;  %v308_v49 = vrot.slane %v307_v41, 4  ;;  %v623_v50 = vrot.slane %v4279_v30, 5  ;;  %v627_v51 = vrot.slane %v4282_v31, 5  ;;  %4008 = vmatprep.subr.bf16.mxu1 %v4287_v32  ;;  %v4317_v3 = vld [vmem:[%s4264_s30 + $0x24] sm:$0x1] }
  0x1c   : > { %v299_v52 = vsel %vm4291_vm3, %v294_v40, %v298_v43  ;;  %v312_v53 = vrot.slane %v310_v44, 5  ;;  %v322_v54 = vrot.slane %v321_v45, 4  ;;  %v326_v55 = vrot.slane %v324_v46, 5  ;;  %v4327_v13 = vld [vmem:[%s4264_s30 + $0x2c] sm:$0x1] }
  0x1d   : > { %v3552_v57 = vcombine.low %v285_v48, %v299_v52  ;;  %v329_v58 = vshrl.u32 %v255_v42, 16  ;;  %v332_v59 = vshll.u32 %v255_v42, 16  ;;  %v343_v60 = vshrl.u32 %v256_v47, 16  ;;  %v4332_v19 = vld [vmem:[%s4264_s30 + $0x34] sm:$0x1] }
  0x1e   : > { %v313_v62 = vsel %vm4291_vm3, %v308_v49, %v312_v53  ;;  %v327_v63 = vsel %vm4291_vm3, %v322_v54, %v326_v55  ;;  %v346_v0 = vshll.u32 %v256_v47, 16  ;;  %v3563_v1 = vcombine.low %v255_v42, %v256_v47  ;;  %v4335_v20 = vld [vmem:[%s4264_s30 + $0x3c] sm:$0x1]  ;;  %v4339_v26 = vld [vmem:[%s4264_s30] sm:$0xe] }
  0x1f   : > { %3960 = vmatprep.mubr.msk.bf16.mxu0 %vm405_vm1, %v3552_v57  ;;  %v3553_v4 = vcombine.low %v313_v62, %v327_v63  ;;  %v331_v5 = vrot.slane %v329_v58, 4  ;;  %v334_v6 = vrot.slane %v332_v59, 5  ;;  %v345_v7 = vrot.slane %v343_v60, 4  ;;  %v751_v40 = vld [vmem:[%s4264_s30 + $0x4] sm:$0x3] }
  0x20   : > { %v348_v9 = vrot.slane %v346_v0, 5  ;;  %3974 = vmatprep.mubr.msk.bf16.mxu1 %vm405_vm1, %v3563_v1  ;;  %v357_v10 = vshrl.u32 %v257_v56, 16  ;;  %v360_v11 = vshll.u32 %v257_v56, 16  ;;  %v371_v12 = vshrl.u32 %v258_v61, 16  ;;  %v4351_v48 = vld [vmem:[%s4264_s30 + $0x8] sm:$0xe] }
  0x21   : > { %3961 = vmatmul.mubr.msk.bf16.vlgmr.msra.gmra.mxu0 %vm405_vm1, %v3553_v4  ;;  %v374_v14 = vshll.u32 %v258_v61, 16  ;;  %v3564_v15 = vcombine.low %v257_v56, %v258_v61  ;;  %v335_v17 = vor.u32 %v334_v6, %v331_v5  ;;  %v338_v18 = vshll.u32 %v4317_v3, 16  ;;  %v752_v54 = vld [vmem:[%s4264_s30 + $0xc] sm:$0x3]  ;;  %v4360_v61 = vld [vmem:[%s4264_s30 + $0x10] sm:$0xe] }
  0x22   : > { %3979 = vmatpush3.bf16.msra.mxu0 %v4254_v2  ;;  %v359_v22 = vrot.slane %v357_v10, 4  ;;  %v362_v23 = vrot.slane %v360_v11, 5  ;;  %v373_v24 = vrot.slane %v371_v12, 4  ;;  %v349_v25 = vor.u32 %v348_v9, %v345_v7  ;;  %v753_v9 = vld [vmem:[%s4264_s30 + $0x14] sm:$0x3] }
  0x23   : > { %v376_v27 = vrot.slane %v374_v14, 5  ;;  %3975 = vmatmul.mubr.msk.bf16.gmra.mxu1 %vm405_vm1, %v3564_v15  ;;  %v336_v28 = vrot.slane %v335_v17, 4  ;;  %v340_v29 = vrot.slane %v338_v18, 5  ;;  %v352_v33 = vshll.u32 %v4327_v13, 16  ;;  %3998 = vmatprep.subr.bf16.mxu0 %v4323_v8  ;;  %v589_v15 = vld [vmem:[%s4264_s30 + $0x18] sm:$0xe] }
  0x24   : > { %v350_v35 = vrot.slane %v349_v25, 4  ;;  %v363_v38 = vor.u32 %v362_v23, %v359_v22  ;;  %v366_v2 = vshll.u32 %v4332_v19, 16  ;;  %v380_v39 = vshll.u32 %v4335_v20, 16 }
  0x25   : > { %v341_v41 = vsel %vm4291_vm3, %v336_v28, %v340_v29  ;;  %v354_v42 = vrot.slane %v352_v33, 5  ;;  %v377_v43 = vor.u32 %v376_v27, %v373_v24  ;;  %v763_v44 = vshrl.u32 %v4339_v26, 16  ;;  %v754_v28 = vld [vmem:[%s4264_s30 + $0x1c] sm:$0x3] }
  0x26   : > { %v364_v45 = vrot.slane %v363_v38, 4  ;;  %v368_v46 = vrot.slane %v366_v2, 5  ;;  %v382_v47 = vrot.slane %v380_v39, 5  ;;  %v766_v49 = vshll.u32 %v4339_v26, 16 }
  0x27   : > { %v355_v52 = vsel %vm4291_vm3, %v350_v35, %v354_v42  ;;  %v378_v53 = vrot.slane %v377_v43, 4  ;;  %v765_v55 = vrot.slane %v763_v44, 5  ;;  %v772_v56 = vshrl.u32 %v751_v40, 16 }
  0x28   : > { %v3554_v57 = vcombine.low %v341_v41, %v355_v52  ;;  %v369_v58 = vsel %vm4291_vm3, %v364_v45, %v368_v46  ;;  %v768_v59 = vrot.slane %v766_v49, 6  ;;  %v775_v60 = vshll.u32 %v751_v40, 16 }
  0x29   : > { %v383_v62 = vsel %vm4291_vm3, %v378_v53, %v382_v47  ;;  %v774_v63 = vrot.slane %v772_v56, 5  ;;  %v781_v0 = vshrl.u32 %v4351_v48, 16  ;;  %v784_v1 = vshll.u32 %v4351_v48, 16  ;;  %v4391_v56 = vld [vmem:[%s4264_s30 + $0x20] sm:$0xe] }
  0x2a   : > { %3964 = vmatprep.mubr.msk.bf16.mxu0 %vm405_vm1, %v3554_v57  ;;  %v3555_v4 = vcombine.low %v369_v58, %v383_v62  ;;  %v769_v5 = vor.u32 %v768_v59, %v765_v55  ;;  %v777_v6 = vrot.slane %v775_v60, 6  ;;  %v790_v7 = vshrl.u32 %v752_v54, 16  ;;  %v755_v62 = vld [vmem:[%s4264_s30 + $0x24] sm:$0x3] }
  0x2b   : > { %v783_v11 = vrot.slane %v781_v0, 5  ;;  %v786_v12 = vrot.slane %v784_v1, 6  ;;  %v793_v14 = vshll.u32 %v752_v54, 16  ;;  %v799_v17 = vshrl.u32 %v4360_v61, 16 }
  0x2c   : > { %3965 = vmatmul.mubr.msk.bf16.gmra.mxu0 %vm405_vm1, %v3555_v4  ;;  %v770_v18 = vrot.slane %v769_v5, 4  ;;  %v778_v22 = vor.u32 %v777_v6, %v774_v63  ;;  %v792_v23 = vrot.slane %v790_v7, 5  ;;  %v802_v24 = vshll.u32 %v4360_v61, 16  ;;  %v4400_v5 = vld [vmem:[%s4264_s30 + $0x28] sm:$0xe] }
  0x2d   : > { %v787_v25 = vor.u32 %v786_v12, %v783_v11  ;;  %v795_v27 = vrot.slane %v793_v14, 6  ;;  %v801_v29 = vrot.slane %v799_v17, 5  ;;  %v808_v33 = vshrl.u32 %v753_v9, 16 }
  0x2e   : > { %v779_v35 = vsel %vm4370_vm8, %v770_v18, %v778_v22  ;;  %v804_v38 = vrot.slane %v802_v24, 6  ;;  %v811_v2 = vshll.u32 %v753_v9, 16  ;;  %v817_v39 = vshrl.u32 %v589_v15, 16  ;;  %v756_v9 = vld [vmem:[%s4264_s30 + $0x2c] sm:$0x3] }
  0x2f   : > { %v788_v40 = vrot.slane %v787_v25, 4  ;;  %v796_v41 = vor.u32 %v795_v27, %v792_v23  ;;  %v810_v42 = vrot.slane %v808_v33, 5  ;;  %v820_v43 = vshll.u32 %v589_v15, 16  ;;  %v4429_v23 = vld [vmem:[%s4264_s30 + $0x30] sm:$0xe]  ;;  %v4437_v25 = vld [vmem:[%s5196_s1 + $0x38] sm:$0xff]  }
  0x30   : > { %v805_v44 = vor.u32 %v804_v38, %v801_v29  ;;  %v813_v45 = vrot.slane %v811_v2, 6  ;;  %v819_v46 = vrot.slane %v817_v39, 5  ;;  %v826_v47 = vshrl.u32 %v754_v28, 16 }
  0x31   : > { %v797_v52 = vsel %vm4370_vm8, %v788_v40, %v796_v41  ;;  %v822_v53 = vrot.slane %v820_v43, 6  ;;  %v829_v54 = vshll.u32 %v754_v28, 16  ;;  %v3570_v55 = vrot.slane %v4339_v26, 9  ;;  %v4444_v40 = vld [vmem:[%s4264_s30 + $0x38] sm:$0xe] }
  0x32   : > { %v3591_v57 = vcombine.low %v779_v35, %v797_v52  ;;  %v806_v58 = vrot.slane %v805_v44, 4  ;;  %v814_v59 = vor.u32 %v813_v45, %v810_v42  ;;  %v828_v60 = vrot.slane %v826_v47, 5  ;;  %v757_v35 = vld [vmem:[%s4264_s30 + $0x34] sm:$0x3]  ;;  %v758_v52 = vld [vmem:[%s4264_s30 + $0x3c] sm:$0x3] }
  0x33   : > { %v823_v63 = vor.u32 %v822_v53, %v819_v46  ;;  %v831_v0 = vrot.slane %v829_v54, 6  ;;  %v616_v1 = vsel %vm4383_vm9, %v3570_v55, %v615_v36  ;;  %v3571_v4 = vrot.slane %v4351_v48, 9 }
  0x34   : > { %3990 = vmatprep.mubr.msk.bf16.mxu1 %vm405_vm1, %v3591_v57  ;;  %v815_v26 = vsel %vm4370_vm8, %v806_v58, %v814_v59  ;;  %v3572_v6 = vrot.slane %v4360_v61, 9  ;;  %v3573_v7 = vrot.slane %v589_v15, 9  ;;  %v835_v11 = vshrl.u32 %v4391_v56, 16 }
  0x35   : > { %v824_v16 = vrot.slane %v823_v63, 4  ;;  %v832_v12 = vor.u32 %v831_v0, %v828_v60  ;;  %v620_v36 = vsel %vm4383_vm9, %v3571_v4, %v619_v37  ;;  %v838_v48 = vshll.u32 %v4391_v56, 16 }
  0x36   : > { %v3580_v14 = vcombine.low %v616_v1, %v620_v36  ;;  %v624_v61 = vsel %vm4383_vm9, %v3572_v6, %v623_v50  ;;  %v628_v15 = vsel %vm4383_vm9, %v3573_v7, %v627_v51  ;;  %v837_v17 = vrot.slane %v835_v11, 5  ;;  %v3619_v11 = vld [vmem:[%s4264_s30 + $0x8] sm:$0xf] }
  0x37   : > { %v833_v37 = vsel %vm4370_vm8, %v824_v16, %v832_v12  ;;  %v3581_v18 = vcombine.low %v624_v61, %v628_v15  ;;  %v840_v30 = vrot.slane %v838_v48, 6  ;;  %v844_v22 = vshrl.u32 %v755_v62, 16 }
  0x38   : > { %v3592_v50 = vcombine.low %v815_v26, %v833_v37  ;;  %3980 = vmatprep.mubr.msk.bf16.mxu0 %vm405_vm1, %v3580_v14  ;;  %v847_v31 = vshll.u32 %v755_v62, 16  ;;  %v853_v51 = vshrl.u32 %v4400_v5, 16  ;;  %v856_v24 = vshll.u32 %v4400_v5, 16  ;;  %v4461_v14 = vld [vmem:[%s4264_s30 + $0xc] sm:$0x1] }
  0x39   : > { %3981 = vmatmul.mubr.msk.bf16.vlgmr.msra.gmra.mxu0 %vm405_vm1, %v3581_v18  ;;  %v841_v27 = vor.u32 %v840_v30, %v837_v17  ;;  %v846_v28 = vrot.slane %v844_v22, 5  ;;  %v862_v29 = vshrl.u32 %v756_v9, 16  ;;  %v865_v33 = vshll.u32 %v756_v9, 16 }
  0x3a   : > { %3991 = vmatmul.mubr.msk.bf16.vlgmr.msra.gmra.mxu1 %vm405_vm1, %v3592_v50  ;;  %3999 = vmatpush3.bf16.msra.mxu0 %v4323_v8  ;;  %v849_v38 = vrot.slane %v847_v31, 6  ;;  %v855_v2 = vrot.slane %v853_v51, 5  ;;  %v858_v39 = vrot.slane %v856_v24, 6  ;;  %v871_v41 = vshrl.u32 %v4429_v23, 16  ;;  %v3621_v51 = vld [vmem:[%s4264_s30 + $0x10] sm:$0xf] }
  0x3b   : > { %4009 = vmatpush3.bf16.msra.mxu1 %v4287_v32  ;;  %v842_v42 = vrot.slane %v841_v27, 4  ;;  %v864_v43 = vrot.slane %v862_v29, 5  ;;  %v867_v44 = vrot.slane %v865_v33, 6  ;;  %v874_v45 = vshll.u32 %v4429_v23, 16  ;;  %4018 = vmatprep.subr.bf16.mxu0 %v4424_v21 }
  0x3c   : > { %v850_v46 = vor.u32 %v849_v38, %v846_v28  ;;  %v859_v47 = vor.u32 %v858_v39, %v855_v2  ;;  %v873_v8 = vrot.slane %v871_v41, 5  ;;  %v880_v53 = vshrl.u32 %v757_v35, 16  ;;  %4028 = vmatprep.subr.bf16.mxu1 %v4437_v25  ;;  %v3623_v38 = vld [vmem:[%s4264_s30 + $0x18] sm:$0xf]  ;;  %v4488_v2 = vld [vmem:[%s4264_s30 + $0x1c] sm:$0x1] }
  0x3d   : > { %v868_v54 = vor.u32 %v867_v44, %v864_v43  ;;  %v876_v55 = vrot.slane %v874_v45, 6  ;;  %v883_v57 = vshll.u32 %v757_v35, 16  ;;  %v889_v32 = vshrl.u32 %v4444_v40, 16  ;;  %v4154_v43 = vld [vmem:[%s4264_s30 + $0x8] ss:$8 sps:$4 sm:$0xff]  }
  0x3e   : > { %v851_v58 = vsel %vm4370_vm8, %v842_v42, %v850_v46  ;;  %v860_v59 = vrot.slane %v859_v47, 4  ;;  %v882_v60 = vrot.slane %v880_v53, 5  ;;  %v892_v62 = vshll.u32 %v4444_v40, 16  ;;  %v3625_v42 = vld [vmem:[%s4264_s30 + $0x20] sm:$0xf] }
  0x3f   : > { %v877_v63 = vor.u32 %v876_v55, %v873_v8  ;;  %v885_v0 = vrot.slane %v883_v57, 6  ;;  %v891_v1 = vrot.slane %v889_v32, 5  ;;  %v898_v4 = vshrl.u32 %v758_v52, 16  ;;  %v3627_v8 = vld [vmem:[%s4264_s30 + $0x28] sm:$0xf] }
  0x40   : > { %v869_v26 = vsel %vm4370_vm8, %v860_v59, %v868_v54  ;;  %v894_v6 = vrot.slane %v892_v62, 6  ;;  %v901_v7 = vshll.u32 %v758_v52, 16  ;;  %v3574_v9 = vrot.slane %v4391_v56, 9  ;;  %v4496_v52 = vld [vmem:[%s4264_s30 + $0x24] sm:$0x1] }
  0x41   : > { %v3593_v16 = vcombine.low %v851_v58, %v869_v26  ;;  %v878_v12 = vrot.slane %v877_v63, 4  ;;  %v886_v36 = vor.u32 %v885_v0, %v882_v60  ;;  %v900_v48 = vrot.slane %v898_v4, 5  ;;  %v4502_v32 = vld [vmem:[%s4264_s30 + $0x2c] sm:$0x1]  ;;  %v3629_v26 = vld [vmem:[%s4264_s30 + $0x30] sm:$0xf] }
  0x42   : > { %v895_v61 = vor.u32 %v894_v6, %v891_v1  ;;  %v903_v15 = vrot.slane %v901_v7, 6  ;;  %v631_v17 = vrot.slane %v4317_v3, 5  ;;  %v3575_v37 = vrot.slane %v4400_v5, 9 }
  0x43   : > { %3994 = vmatprep.mubr.msk.bf16.mxu1 %vm405_vm1, %v3593_v16  ;;  %v887_v56 = vsel %vm4370_vm8, %v878_v12, %v886_v36  ;;  %v635_v18 = vrot.slane %v4327_v13, 5  ;;  %v3576_v30 = vrot.slane %v4429_v23, 9  ;;  %v639_v22 = vrot.slane %v4332_v19, 5  ;;  %v4481_v19 = vld [vmem:[%s4264_s30 + $0x14] sm:$0x1] }
  0x44   : > { %v896_v50 = vrot.slane %v895_v61, 4  ;;  %v904_v31 = vor.u32 %v903_v15, %v900_v48  ;;  %v632_v3 = vsel %vm4383_vm9, %v3574_v9, %v631_v17  ;;  %v3577_v5 = vrot.slane %v4444_v40, 9  ;;  %v4156_v16 = vld [vmem:[%s4264_s30 + $0x18] ss:$8 sps:$4 sm:$0xff]   ;;  %v4511_v61 = vld [vmem:[%s4264_s30 + $0x34] sm:$0x1] }
  0x45   : > { %v636_v24 = vsel %vm4383_vm9, %v3575_v37, %v635_v18  ;;  %v640_v13 = vsel %vm4383_vm9, %v3576_v30, %v639_v22  ;;  %v643_v23 = vrot.slane %v4335_v20, 5  ;;  %v1152_v27 = vshrl.u32 %v3619_v11, 16  ;;  %v3631_v30 = vld [vmem:[%s4264_s30 + $0x38] sm:$0xf] }
  0x46   : > { %v905_v28 = vsel %vm4370_vm8, %v896_v50, %v904_v31  ;;  %v3582_v29 = vcombine.low %v632_v3, %v636_v24  ;;  %v1155_v33 = vshll.u32 %v3619_v11, 16  ;;  %v1161_v35 = vshll.u32 %v4461_v14, 16 }
  0x47   : > { %v3594_v39 = vcombine.low %v887_v56, %v905_v28  ;;  %v644_v40 = vsel %vm4383_vm9, %v3577_v5, %v643_v23  ;;  %v1154_v20 = vrot.slane %v1152_v27, 4  ;;  %v1166_v41 = vshrl.u32 %v3621_v51, 16  ;;  %v4518_v5 = vld [vmem:[%s4264_s30 + $0x3c] sm:$0x1]  ;;  %v4158_v27 = vld [vmem:[%s4264_s30 + $0x28] ss:$8 sps:$4 sm:$0xff]  }
  0x48   : > { %3984 = vmatprep.mubr.msk.bf16.mxu0 %vm405_vm1, %v3582_v29  ;;  %v3583_v44 = vcombine.low %v640_v13, %v644_v40  ;;  %v1157_v45 = vrot.slane %v1155_v33, 5  ;;  %v1163_v46 = vrot.slane %v1161_v35, 5  ;;  %v1169_v47 = vshll.u32 %v3621_v51, 16  ;;  %v4526_v28 = vld [vmem:[%s5196_s1 + $0x40] sm:$0xff]  }
  0x49   : > { %3995 = vmatmul.mubr.msk.bf16.gmra.mxu1 %vm405_vm1, %v3594_v39  ;;  %v1168_v53 = vrot.slane %v1166_v41, 4  ;;  %v1175_v54 = vshll.u32 %v4481_v19, 16  ;;  %v1180_v55 = vshrl.u32 %v3623_v38, 16  ;;  %v1183_v57 = vshll.u32 %v3623_v38, 16  ;;  %v3633_v39 = vld [vmem:[%s4264_s30 + $0x40] sm:$0xf] }
  0x4a   : > { %3985 = vmatmul.mubr.msk.bf16.gmra.mxu0 %vm405_vm1, %v3583_v44  ;;  %v1158_v58 = vor.u32 %v1157_v45, %v1154_v20  ;;  %v1171_v59 = vrot.slane %v1169_v47, 5  ;;  %v1189_v60 = vshll.u32 %v4488_v2, 16  ;;  %v1194_v62 = vshrl.u32 %v3625_v42, 16 }
  0x4b   : > { %v1177_v63 = vrot.slane %v1175_v54, 5  ;;  %v1182_v0 = vrot.slane %v1180_v55, 4  ;;  %v1185_v1 = vrot.slane %v1183_v57, 5  ;;  %v1197_v4 = vshll.u32 %v3625_v42, 16  ;;  %4000 = vmatprep.mubr.msk.bf16.mxu0 %vm405_vm1, %v4154_v43  ;;  %v4534_v42 = vld [vmem:[%s4264_s30 + $0x44] sm:$0x1] }
  0x4c   : > { %v1159_v6 = vrot.slane %v1158_v58, 4  ;;  %v1172_v7 = vor.u32 %v1171_v59, %v1168_v53  ;;  %v1191_v9 = vrot.slane %v1189_v60, 5  ;;  %v1196_v11 = vrot.slane %v1194_v62, 4 }
  0x4d   : > { %v1186_v12 = vor.u32 %v1185_v1, %v1182_v0  ;;  %v1199_v36 = vrot.slane %v1197_v4, 5  ;;  %v1203_v48 = vshll.u32 %v4496_v52, 16  ;;  %v1208_v15 = vshrl.u32 %v3627_v8, 16 }
  0x4e   : > { %v1164_v17 = vsel %vm4291_vm3, %v1159_v6, %v1163_v46  ;;  %v1173_v37 = vrot.slane %v1172_v7, 4  ;;  %v1211_v56 = vshll.u32 %v3627_v8, 16  ;;  %v1217_v18 = vshll.u32 %v4502_v32, 16  ;;  %v4542_v8 = vld [vmem:[%s4264_s30 + $0x8] sm:$0xe] }
  0x4f   : > { %v1187_v22 = vrot.slane %v1186_v12, 4  ;;  %v1200_v50 = vor.u32 %v1199_v36, %v1196_v11  ;;  %v1205_v31 = vrot.slane %v1203_v48, 5  ;;  %v1210_v3 = vrot.slane %v1208_v15, 4 }
  0x50   : > { %v1178_v51 = vsel %vm4291_vm3, %v1173_v37, %v1177_v63  ;;  %v1213_v24 = vrot.slane %v1211_v56, 5  ;;  %v1219_v13 = vrot.slane %v1217_v18, 5  ;;  %v1222_v23 = vshrl.u32 %v3629_v26, 16  ;;  %v3673_v63 = vld [vmem:[%s4264_s30 + $0xc] sm:$0x3] }
  0x51   : > { %v3637_v29 = vcombine.low %v1164_v17, %v1178_v51  ;;  %v1192_v33 = vsel %vm4291_vm3, %v1187_v22, %v1191_v9  ;;  %v1201_v35 = vrot.slane %v1200_v50, 4  ;;  %v1225_v38 = vshll.u32 %v3629_v26, 16  ;;  %v4159_v26 = vld [vmem:[%s4264_s30 + $0x38] ss:$8 sps:$4 sm:$0xff]  }
  0x52   : > { %4001 = vmatmul.mubr.msk.bf16.vlgmr.msra.gmra.mxu0 %vm405_vm1, %v4156_v16  ;;  %v1214_v40 = vor.u32 %v1213_v24, %v1210_v3  ;;  %v1224_v20 = vrot.slane %v1222_v23, 4  ;;  %v1231_v41 = vshll.u32 %v4511_v61, 16  ;;  %v1236_v43 = vshrl.u32 %v3631_v30, 16  ;;  %v4560_v16 = vld [vmem:[%s4264_s30 + $0x10] sm:$0xe] }
  0x53   : > { %4010 = vmatprep.mubr.msk.bf16.mxu1 %vm405_vm1, %v3637_v29  ;;  %v1206_v44 = vsel %vm4291_vm3, %v1201_v35, %v1205_v31  ;;  %4019 = vmatpush3.bf16.msra.mxu0 %v4424_v21  ;;  %v1227_v45 = vrot.slane %v1225_v38, 5  ;;  %v1239_v46 = vshll.u32 %v3631_v30, 16  ;;  %v1245_v47 = vshll.u32 %v4518_v5, 16  ;;  %v4549_v21 = vld [vmem:[%s5196_s1 + $0x48] sm:$0xff]   ;;  %v4570_v51 = vld [vmem:[%s4264_s30 + $0x18] sm:$0xe] }
  0x54   : > { %v3638_v53 = vcombine.low %v1192_v33, %v1206_v44  ;;  %v1215_v54 = vrot.slane %v1214_v40, 4  ;;  %v1233_v55 = vrot.slane %v1231_v41, 5  ;;  %v1238_v57 = vrot.slane %v1236_v43, 4  ;;  %4004 = vmatprep.mubr.msk.bf16.mxu0 %vm405_vm1, %v4158_v27  ;;  %4038 = vmatprep.subr.bf16.mxu0 %v4526_v28  ;;  %v3675_v29 = vld [vmem:[%s4264_s30 + $0x1c] sm:$0x3] }
  0x55   : > { %v1228_v58 = vor.u32 %v1227_v45, %v1224_v20  ;;  %v1241_v59 = vrot.slane %v1239_v46, 5  ;;  %v1247_v60 = vrot.slane %v1245_v47, 5  ;;  %v1250_v62 = vshrl.u32 %v3633_v39, 16  ;;  %v4578_v40 = vld [vmem:[%s4264_s30 + $0x20] sm:$0xe] }
  0x56   : > { %4011 = vmatmul.mubr.msk.bf16.vlgmr.msra.gmra.mxu1 %vm405_vm1, %v3638_v53  ;;  %v1220_v0 = vsel %vm4291_vm3, %v1215_v54, %v1219_v13  ;;  %v1253_v1 = vshll.u32 %v3633_v39, 16  ;;  %v1259_v4 = vshll.u32 %v4534_v42, 16  ;;  %v1540_v6 = vshrl.u32 %v4542_v8, 16  ;;  %v3676_v20 = vld [vmem:[%s4264_s30 + $0x24] sm:$0x3] }
  0x57   : > { %4029 = vmatpush3.bf16.msra.mxu1 %v4437_v25  ;;  %v1229_v7 = vrot.slane %v1228_v58, 4  ;;  %v1242_v9 = vor.u32 %v1241_v59, %v1238_v57  ;;  %v1252_v11 = vrot.slane %v1250_v62, 4  ;;  %v1543_v12 = vshll.u32 %v4542_v8, 16  ;;  %v3674_v25 = vld [vmem:[%s4264_s30 + $0x14] sm:$0x3] }
  0x58   : > { %v1255_v36 = vrot.slane %v1253_v1, 5  ;;  %v1261_v48 = vrot.slane %v1259_v4, 5  ;;  %v1542_v15 = vrot.slane %v1540_v6, 5  ;;  %v1549_v17 = vshrl.u32 %v3673_v63, 16  ;;  %4048 = vmatprep.subr.bf16.mxu1 %v4549_v21 }
  0x59   : > { %v1234_v37 = vsel %vm4291_vm3, %v1229_v7, %v1233_v55  ;;  %v1243_v56 = vrot.slane %v1242_v9, 4  ;;  %v1545_v18 = vrot.slane %v1543_v12, 6  ;;  %v1552_v30 = vshll.u32 %v3673_v63, 16 }
  0x5a   : > { %v3639_v22 = vcombine.low %v1220_v0, %v1234_v37  ;;  %v1256_v50 = vor.u32 %v1255_v36, %v1252_v11  ;;  %4005 = vmatmul.mubr.msk.bf16.gmra.mxu0 %vm405_vm1, %v4159_v26  ;;  %v1551_v31 = vrot.slane %v1549_v17, 5  ;;  %v1558_v3 = vshrl.u32 %v4560_v16, 16 }
  0x5b   : > { %v1248_v24 = vsel %vm4291_vm3, %v1243_v56, %v1247_v60  ;;  %v1546_v13 = vor.u32 %v1545_v18, %v1542_v15  ;;  %v1554_v23 = vrot.slane %v1552_v30, 6  ;;  %v1561_v27 = vshll.u32 %v4560_v16, 16 }
  0x5c   : > { %4014 = vmatprep.mubr.msk.bf16.mxu1 %vm405_vm1, %v3639_v22  ;;  %v1257_v33 = vrot.slane %v1256_v50, 4  ;;  %v1560_v35 = vrot.slane %v1558_v3, 5  ;;  %v1567_v38 = vshrl.u32 %v3674_v25, 16  ;;  %v1570_v39 = vshll.u32 %v3674_v25, 16  ;;  %v4596_v3 = vld [vmem:[%s4264_s30 + $0x28] sm:$0xe] }
  0x5d   : > { %v1547_v41 = vrot.slane %v1546_v13, 4  ;;  %v1555_v43 = vor.u32 %v1554_v23, %v1551_v31  ;;  %v1563_v44 = vrot.slane %v1561_v27, 6  ;;  %v1576_v45 = vshrl.u32 %v4570_v51, 16 }
  0x5e   : > { %v1262_v46 = vsel %vm4291_vm3, %v1257_v33, %v1261_v48  ;;  %v1569_v47 = vrot.slane %v1567_v38, 5  ;;  %v1572_v53 = vrot.slane %v1570_v39, 6  ;;  %v1579_v54 = vshll.u32 %v4570_v51, 16 }
  0x5f   : > { %v3640_v55 = vcombine.low %v1248_v24, %v1262_v46  ;;  %v1556_v57 = vsel %vm4370_vm8, %v1547_v41, %v1555_v43  ;;  %v1564_v58 = vor.u32 %v1563_v44, %v1560_v35  ;;  %v1578_v59 = vrot.slane %v1576_v45, 5  ;;  %v4609_v35 = vld [vmem:[%s4264_s30 + $0x30] sm:$0xe]  ;;  %v4624_v44 = vld [vmem:[%s5196_s1 + $0x58] sm:$0xff]  }
  0x60   : > { %v1573_v60 = vor.u32 %v1572_v53, %v1569_v47  ;;  %v1581_v62 = vrot.slane %v1579_v54, 6  ;;  %v1585_v63 = vshrl.u32 %v3675_v29, 16  ;;  %v1588_v0 = vshll.u32 %v3675_v29, 16  ;;  %v3677_v29 = vld [vmem:[%s4264_s30 + $0x2c] sm:$0x3] }
  0x61   : > { %4015 = vmatmul.mubr.msk.bf16.gmra.mxu1 %vm405_vm1, %v3640_v55  ;;  %v1565_v1 = vrot.slane %v1564_v58, 4  ;;  %v1594_v4 = vshrl.u32 %v4578_v40, 16  ;;  %v1597_v26 = vshll.u32 %v4578_v40, 16  ;;  %v1603_v6 = vshrl.u32 %v3676_v20, 16  ;;  %v4629_v53 = vld [vmem:[%s4264_s30 + $0x38] sm:$0xe] }
  0x62   : > { %v1582_v7 = vor.u32 %v1581_v62, %v1578_v59  ;;  %v1587_v9 = vrot.slane %v1585_v63, 5  ;;  %v1590_v11 = vrot.slane %v1588_v0, 6  ;;  %v1606_v12 = vshll.u32 %v3676_v20, 16  ;;  %v4636_v59 = vld [vmem:[%s5196_s1 + $0x50] sm:$0xff]  }
  0x63   : > { %v1574_v36 = vsel %vm4370_vm8, %v1565_v1, %v1573_v60  ;;  %v1596_v48 = vrot.slane %v1594_v4, 5  ;;  %v1599_v15 = vrot.slane %v1597_v26, 6  ;;  %v1605_v17 = vrot.slane %v1603_v6, 5  ;;  %v3679_v1 = vld [vmem:[%s4264_s30 + $0x3c] sm:$0x3] }
  0x64   : > { %v3683_v37 = vcombine.low %v1556_v57, %v1574_v36  ;;  %v1583_v56 = vrot.slane %v1582_v7, 4  ;;  %v1591_v25 = vor.u32 %v1590_v11, %v1587_v9  ;;  %v1608_v18 = vrot.slane %v1606_v12, 6  ;;  %v4644_v6 = vld [vmem:[%s4264_s30 + $0x40] sm:$0xe] }
  0x65   : > { %v1600_v30 = vor.u32 %v1599_v15, %v1596_v48  ;;  %v3654_v22 = vrot.slane %v4542_v8, 9  ;;  %v1395_v50 = vrot.slane %v4461_v14, 5  ;;  %v3655_v31 = vrot.slane %v4560_v16, 9 }
  0x66   : > { %4030 = vmatprep.mubr.msk.bf16.mxu1 %vm405_vm1, %v3683_v37  ;;  %v1592_v24 = vsel %vm4370_vm8, %v1583_v56, %v1591_v25  ;;  %v1609_v13 = vor.u32 %v1608_v18, %v1605_v17  ;;  %v1399_v23 = vrot.slane %v4481_v19, 5  ;;  %v3656_v27 = vrot.slane %v4570_v51, 9  ;;  %v3678_v19 = vld [vmem:[%s4264_s30 + $0x34] sm:$0x3]  ;;  %v3680_v17 = vld [vmem:[%s4264_s30 + $0x44] sm:$0x3] }
  0x67   : > { %v1601_v33 = vrot.slane %v1600_v30, 4  ;;  %v1396_v14 = vsel %vm4383_vm9, %v3654_v22, %v1395_v50  ;;  %v1403_v8 = vrot.slane %v4488_v2, 5  ;;  %v3657_v16 = vrot.slane %v4578_v40, 9 }
  0x68   : > { %v1400_v38 = vsel %vm4383_vm9, %v3655_v31, %v1399_v23  ;;  %v1407_v39 = vrot.slane %v4496_v52, 5  ;;  %v1612_v51 = vshrl.u32 %v4596_v3, 16  ;;  %v1615_v20 = vshll.u32 %v4596_v3, 16 }
  0x69   : > { %v1610_v41 = vsel %vm4370_vm8, %v1601_v33, %v1609_v13  ;;  %v3664_v43 = vcombine.low %v1396_v14, %v1400_v38  ;;  %v1404_v2 = vsel %vm4383_vm9, %v3656_v27, %v1403_v8  ;;  %v1621_v40 = vshrl.u32 %v3677_v29, 16 }
  0x6a   : > { %v3684_v45 = vcombine.low %v1592_v24, %v1610_v41  ;;  %v1408_v52 = vsel %vm4383_vm9, %v3657_v16, %v1407_v39  ;;  %v1614_v46 = vrot.slane %v1612_v51, 5  ;;  %v1617_v47 = vrot.slane %v1615_v20, 6 }
  0x6b   : > { %4020 = vmatprep.mubr.msk.bf16.mxu0 %vm405_vm1, %v3664_v43  ;;  %v3665_v54 = vcombine.low %v1404_v2, %v1408_v52  ;;  %v1623_v55 = vrot.slane %v1621_v40, 5  ;;  %v1624_v57 = vshll.u32 %v3677_v29, 16  ;;  %v1630_v58 = vshrl.u32 %v4609_v35, 16  ;;  %v3711_v40 = vld [vmem:[%s4264_s30 + $0x10] sm:$0xf] }
  0x6c   : > { %4031 = vmatmul.mubr.msk.bf16.vlgmr.msra.gmra.mxu1 %vm405_vm1, %v3684_v45  ;;  %v1618_v60 = vor.u32 %v1617_v47, %v1614_v46  ;;  %v1633_v62 = vshll.u32 %v4609_v35, 16  ;;  %v1639_v63 = vshrl.u32 %v3678_v19, 16  ;;  %v1642_v0 = vshll.u32 %v3678_v19, 16  ;;  %v4669_v47 = vld [vmem:[%s4264_s30 + $0x14] sm:$0x1] }
  0x6d   : > { %4021 = vmatmul.mubr.msk.bf16.vlgmr.msra.gmra.mxu0 %vm405_vm1, %v3665_v54  ;;  %4049 = vmatpush3.bf16.msra.mxu1 %v4549_v21  ;;  %v1626_v4 = vrot.slane %v1624_v57, 6  ;;  %v1632_v26 = vrot.slane %v1630_v58, 5  ;;  %v1648_v7 = vshrl.u32 %v4629_v53, 16  ;;  %v1651_v9 = vshll.u32 %v4629_v53, 16  ;;  %v3713_v57 = vld [vmem:[%s4264_s30 + $0x18] sm:$0xf] }
  0x6e   : > { %4039 = vmatpush3.bf16.msra.mxu0 %v4526_v28  ;;  %v1619_v11 = vrot.slane %v1618_v60, 4  ;;  %v1635_v12 = vrot.slane %v1633_v62, 6  ;;  %v1641_v36 = vrot.slane %v1639_v63, 5  ;;  %v1644_v48 = vrot.slane %v1642_v0, 6  ;;  %4068 = vmatprep.subr.bf16.mxu1 %v4624_v44 }
  0x6f   : > { %v1627_v15 = vor.u32 %v1626_v4, %v1623_v55  ;;  %v1650_v37 = vrot.slane %v1648_v7, 5  ;;  %v1653_v21 = vrot.slane %v1651_v9, 6  ;;  %v1657_v56 = vshrl.u32 %v3679_v1, 16  ;;  %4058 = vmatprep.subr.bf16.mxu0 %v4636_v59  ;;  %v3715_v4 = vld [vmem:[%s4264_s30 + $0x20] sm:$0xf] }
  0x70   : > { %v1636_v25 = vor.u32 %v1635_v12, %v1632_v26  ;;  %v1645_v18 = vor.u32 %v1644_v48, %v1641_v36  ;;  %v1660_v30 = vshll.u32 %v3679_v1, 16  ;;  %v1666_v22 = vshrl.u32 %v4644_v6, 16  ;;  %v4688_v26 = vld [vmem:[%s4264_s30 + $0x24] sm:$0x1]  ;;  %v4162_v12 = vld [vmem:[%s4264_s30 + $0x10] ss:$8 sps:$4 sm:$0xff]  }
  0x71   : > { %v1628_v28 = vsel %vm4370_vm8, %v1619_v11, %v1627_v15  ;;  %v1654_v50 = vor.u32 %v1653_v21, %v1650_v37  ;;  %v1659_v31 = vrot.slane %v1657_v56, 5  ;;  %v1669_v24 = vshll.u32 %v4644_v6, 16  ;;  %v3717_v11 = vld [vmem:[%s4264_s30 + $0x28] sm:$0xf]  ;;  %v4698_v56 = vld [vmem:[%s4264_s30 + $0x2c] sm:$0x1] }
  0x72   : > { %v1637_v13 = vrot.slane %v1636_v25, 4  ;;  %v1662_v23 = vrot.slane %v1660_v30, 6  ;;  %v1668_v27 = vrot.slane %v1666_v22, 5  ;;  %v1675_v29 = vshrl.u32 %v3680_v17, 16 }
  0x73   : > { %v1655_v33 = vrot.slane %v1654_v50, 4  ;;  %v1671_v14 = vrot.slane %v1669_v24, 6  ;;  %v1678_v8 = vshll.u32 %v3680_v17, 16  ;;  %v3658_v16 = vrot.slane %v4596_v3, 9 }
  0x74   : > { %v1646_v38 = vsel %vm4370_vm8, %v1637_v13, %v1645_v18  ;;  %v1663_v39 = vor.u32 %v1662_v23, %v1659_v31  ;;  %v1677_v19 = vrot.slane %v1675_v29, 5  ;;  %v1411_v51 = vrot.slane %v4502_v32, 5  ;;  %v3719_v31 = vld [vmem:[%s4264_s30 + $0x30] sm:$0xf]  ;;  %v4705_v29 = vld [vmem:[%s4264_s30 + $0x34] sm:$0x1] }
  0x75   : > { %v3685_v20 = vcombine.low %v1628_v28, %v1646_v38  ;;  %v1672_v41 = vor.u32 %v1671_v14, %v1668_v27  ;;  %v1680_v43 = vrot.slane %v1678_v8, 6  ;;  %v3659_v2 = vrot.slane %v4609_v35, 9  ;;  %v4164_v38 = vld [vmem:[%s4264_s30 + $0x20] ss:$8 sps:$4 sm:$0xff]  }
  0x76   : > { %v1664_v45 = vsel %vm4370_vm8, %v1655_v33, %v1663_v39  ;;  %v1412_v3 = vsel %vm4383_vm9, %v3658_v16, %v1411_v51  ;;  %v1415_v52 = vrot.slane %v4511_v61, 5  ;;  %v3660_v46 = vrot.slane %v4629_v53, 9  ;;  %v4679_v53 = vld [vmem:[%s4264_s30 + $0x1c] sm:$0x1]  ;;  %v3721_v39 = vld [vmem:[%s4264_s30 + $0x38] sm:$0xf] }
  0x77   : > { %4034 = vmatprep.mubr.msk.bf16.mxu1 %vm405_vm1, %v3685_v20  ;;  %v1673_v32 = vrot.slane %v1672_v41, 4  ;;  %v1681_v54 = vor.u32 %v1680_v43, %v1677_v19  ;;  %v1419_v35 = vrot.slane %v4518_v5, 5  ;;  %v3661_v55 = vrot.slane %v4644_v6, 9  ;;  %v4713_v41 = vld [vmem:[%s4264_s30 + $0x3c] sm:$0x1] }
  0x78   : > { %v1416_v58 = vsel %vm4383_vm9, %v3659_v2, %v1415_v52  ;;  %v1423_v61 = vrot.slane %v4534_v42, 5  ;;  %v1929_v60 = vshrl.u32 %v3711_v40, 16  ;;  %v1932_v62 = vshll.u32 %v3711_v40, 16  ;;  %v3723_v2 = vld [vmem:[%s4264_s30 + $0x40] sm:$0xf] }
  0x79   : > { %v1682_v63 = vsel %vm4370_vm8, %v1673_v32, %v1681_v54  ;;  %v3666_v0 = vcombine.low %v1412_v3, %v1416_v58  ;;  %v1420_v5 = vsel %vm4383_vm9, %v3660_v46, %v1419_v35  ;;  %v1938_v1 = vshll.u32 %v4669_v47, 16  ;;  %v4718_v46 = vld [vmem:[%s4264_s30 + $0x44] sm:$0x1]  ;;  %v3725_v32 = vld [vmem:[%s4264_s30 + $0x48] sm:$0xf] }
  0x7a   : > { %v3686_v6 = vcombine.low %v1664_v45, %v1682_v63  ;;  %v1424_v42 = vsel %vm4383_vm9, %v3661_v55, %v1423_v61  ;;  %v1931_v7 = vrot.slane %v1929_v60, 4  ;;  %v1934_v9 = vrot.slane %v1932_v62, 5  ;;  %v4724_v54 = vld [vmem:[%s5196_s1 + $0x60] sm:$0xff]  }
  0x7b   : > { %4024 = vmatprep.mubr.msk.bf16.mxu0 %vm405_vm1, %v3666_v0  ;;  %v3667_v36 = vcombine.low %v1420_v5, %v1424_v42  ;;  %v1940_v48 = vrot.slane %v1938_v1, 5  ;;  %v1943_v15 = vshrl.u32 %v3713_v57, 16  ;;  %v1946_v17 = vshll.u32 %v3713_v57, 16  ;;  %v4166_v0 = vld [vmem:[%s4264_s30 + $0x30] ss:$8 sps:$4 sm:$0xff]  }
  0x7c   : > { %4035 = vmatmul.mubr.msk.bf16.gmra.mxu1 %vm405_vm1, %v3686_v6  ;;  %v1935_v37 = vor.u32 %v1934_v9, %v1931_v7  ;;  %v1952_v21 = vshll.u32 %v4679_v53, 16  ;;  %v1957_v25 = vshrl.u32 %v3715_v4, 16  ;;  %v1960_v18 = vshll.u32 %v3715_v4, 16  ;;  %v4732_v42 = vld [vmem:[%s4264_s30 + $0x4c] sm:$0x1] }
  0x7d   : > { %4025 = vmatmul.mubr.msk.bf16.gmra.mxu0 %vm405_vm1, %v3667_v36  ;;  %v1945_v30 = vrot.slane %v1943_v15, 4  ;;  %v1948_v22 = vrot.slane %v1946_v17, 5  ;;  %v1966_v28 = vshll.u32 %v4688_v26, 16  ;;  %v1971_v50 = vshrl.u32 %v3717_v11, 16 }
  0x7e   : > { %v1936_v24 = vrot.slane %v1935_v37, 4  ;;  %v1954_v13 = vrot.slane %v1952_v21, 5  ;;  %v1959_v23 = vrot.slane %v1957_v25, 4  ;;  %v1962_v27 = vrot.slane %v1960_v18, 5  ;;  %4040 = vmatprep.mubr.msk.bf16.mxu0 %vm405_vm1, %v4162_v12  ;;  %v4740_v37 = vld [vmem:[%s4264_s30 + $0x10] sm:$0xe] }
  0x7f   : > { %v1949_v33 = vor.u32 %v1948_v22, %v1945_v30  ;;  %v1968_v14 = vrot.slane %v1966_v28, 5  ;;  %v1973_v8 = vrot.slane %v1971_v50, 4  ;;  %v1974_v16 = vshll.u32 %v3717_v11, 16 }
  0x80   : > { %v1941_v19 = vsel %vm4291_vm3, %v1936_v24, %v1940_v48  ;;  %v1963_v51 = vor.u32 %v1962_v27, %v1959_v23  ;;  %v1980_v20 = vshll.u32 %v4698_v56, 16  ;;  %v1985_v43 = vshrl.u32 %v3719_v31, 16  ;;  %v3765_v24 = vld [vmem:[%s4264_s30 + $0x14] sm:$0x3] }
  0x81   : > { %v1950_v40 = vrot.slane %v1949_v33, 4  ;;  %v1976_v45 = vrot.slane %v1974_v16, 5  ;;  %v1988_v3 = vshll.u32 %v3719_v31, 16  ;;  %v1994_v52 = vshll.u32 %v4705_v29, 16 }
  0x82   : > { %v1964_v35 = vrot.slane %v1963_v51, 4  ;;  %v1982_v55 = vrot.slane %v1980_v20, 5  ;;  %v1987_v57 = vrot.slane %v1985_v43, 4  ;;  %v1999_v58 = vshrl.u32 %v3721_v39, 16  ;;  %v4761_v20 = vld [vmem:[%s4264_s30 + $0x18] sm:$0xe] }
  0x83   : > { %v1955_v61 = vsel %vm4291_vm3, %v1950_v40, %v1954_v13  ;;  %v1977_v60 = vor.u32 %v1976_v45, %v1973_v8  ;;  %v1990_v62 = vrot.slane %v1988_v3, 5  ;;  %v1996_v63 = vrot.slane %v1994_v52, 5  ;;  %v3766_v3 = vld [vmem:[%s4264_s30 + $0x1c] sm:$0x3] }
  0x84   : > { %v3729_v5 = vcombine.low %v1941_v19, %v1955_v61  ;;  %v1969_v1 = vsel %vm4291_vm3, %v1964_v35, %v1968_v14  ;;  %v2001_v4 = vrot.slane %v1999_v58, 4  ;;  %v2002_v6 = vshll.u32 %v3721_v39, 16  ;;  %v4167_v14 = vld [vmem:[%s4264_s30 + $0x40] ss:$8 sps:$4 sm:$0xff]  }
  0x85   : > { %v1978_v7 = vrot.slane %v1977_v60, 4  ;;  %4041 = vmatmul.mubr.msk.bf16.vlgmr.msra.gmra.mxu0 %vm405_vm1, %v4164_v38  ;;  %v1991_v9 = vor.u32 %v1990_v62, %v1987_v57  ;;  %v2008_v11 = vshll.u32 %v4713_v41, 16  ;;  %v2013_v12 = vshrl.u32 %v3723_v2, 16  ;;  %v4769_v58 = vld [vmem:[%s4264_s30 + $0x20] sm:$0xe] }
  0x86   : > { %4050 = vmatprep.mubr.msk.bf16.mxu1 %vm405_vm1, %v3729_v5  ;;  %4059 = vmatpush3.bf16.msra.mxu0 %v4636_v59  ;;  %v2004_v36 = vrot.slane %v2002_v6, 5  ;;  %v2016_v48 = vshll.u32 %v3723_v2, 16  ;;  %v2022_v15 = vshll.u32 %v4718_v46, 16  ;;  %v2027_v17 = vshrl.u32 %v3725_v32, 16  ;;  %v4749_v59 = vld [vmem:[%s5196_s1 + $0x68] sm:$0xff]  }
  0x87   : > { %v1983_v21 = vsel %vm4291_vm3, %v1978_v7, %v1982_v55  ;;  %v1992_v25 = vrot.slane %v1991_v9, 4  ;;  %v2010_v18 = vrot.slane %v2008_v11, 5  ;;  %v2015_v30 = vrot.slane %v2013_v12, 4  ;;  %4044 = vmatprep.mubr.msk.bf16.mxu0 %vm405_vm1, %v4166_v0  ;;  %4078 = vmatprep.subr.bf16.mxu0 %v4724_v54  ;;  %v3767_v0 = vld [vmem:[%s4264_s30 + $0x24] sm:$0x3] }
  0x88   : > { %v3730_v22 = vcombine.low %v1969_v1, %v1983_v21  ;;  %v2005_v28 = vor.u32 %v2004_v36, %v2001_v4  ;;  %v2018_v50 = vrot.slane %v2016_v48, 5  ;;  %v2024_v31 = vrot.slane %v2022_v15, 5  ;;  %v4778_v7 = vld [vmem:[%s4264_s30 + $0x28] sm:$0xe]  ;;  %v3768_v36 = vld [vmem:[%s4264_s30 + $0x2c] sm:$0x3] }
  0x89   : > { %v1997_v13 = vsel %vm4291_vm3, %v1992_v25, %v1996_v63  ;;  %v2029_v23 = vrot.slane %v2027_v17, 4  ;;  %v2030_v27 = vshll.u32 %v3725_v32, 16  ;;  %v2036_v33 = vshll.u32 %v4732_v42, 16 }
  0x8a   : > { %4051 = vmatmul.mubr.msk.bf16.vlgmr.msra.gmra.mxu1 %vm405_vm1, %v3730_v22  ;;  %v2006_v8 = vrot.slane %v2005_v28, 4  ;;  %v2019_v16 = vor.u32 %v2018_v50, %v2015_v30  ;;  %v2317_v38 = vshrl.u32 %v4740_v37, 16  ;;  %v2320_v39 = vshll.u32 %v4740_v37, 16 }
  0x8b   : > { %4069 = vmatpush3.bf16.msra.mxu1 %v4624_v44  ;;  %v2032_v19 = vrot.slane %v2030_v27, 5  ;;  %v2038_v51 = vrot.slane %v2036_v33, 5  ;;  %v2326_v43 = vshrl.u32 %v3765_v24, 16  ;;  %v2329_v2 = vshll.u32 %v3765_v24, 16 }
  0x8c   : > { %v2011_v40 = vsel %vm4291_vm3, %v2006_v8, %v2010_v18  ;;  %v2020_v45 = vrot.slane %v2019_v16, 4  ;;  %v2319_v52 = vrot.slane %v2317_v38, 5  ;;  %v2322_v32 = vrot.slane %v2320_v39, 6  ;;  %4088 = vmatprep.subr.bf16.mxu1 %v4749_v59 }
  0x8d   : > { %v3731_v35 = vcombine.low %v1997_v13, %v2011_v40  ;;  %v2033_v44 = vor.u32 %v2032_v19, %v2029_v23  ;;  %4045 = vmatmul.mubr.msk.bf16.gmra.mxu0 %vm405_vm1, %v4167_v14  ;;  %v2328_v55 = vrot.slane %v2326_v43, 5  ;;  %v2331_v57 = vrot.slane %v2329_v2, 6 }
  0x8e   : > { %v2025_v61 = vsel %vm4291_vm3, %v2020_v45, %v2024_v31  ;;  %v2323_v60 = vor.u32 %v2322_v32, %v2319_v52  ;;  %v2335_v62 = vshrl.u32 %v4761_v20, 16  ;;  %v2338_v63 = vshll.u32 %v4761_v20, 16 }
  0x8f   : > { %4054 = vmatprep.mubr.msk.bf16.mxu1 %vm405_vm1, %v3731_v35  ;;  %v2034_v5 = vrot.slane %v2033_v44, 4  ;;  %v2332_v1 = vor.u32 %v2331_v57, %v2328_v55  ;;  %v2344_v4 = vshrl.u32 %v3766_v3, 16  ;;  %v2347_v6 = vshll.u32 %v3766_v3, 16  ;;  %v4796_v57 = vld [vmem:[%s4264_s30 + $0x30] sm:$0xe] }
  0x90   : > { %v2324_v9 = vrot.slane %v2323_v60, 4  ;;  %v2337_v11 = vrot.slane %v2335_v62, 5  ;;  %v2340_v12 = vrot.slane %v2338_v63, 6  ;;  %v2353_v48 = vshrl.u32 %v4769_v58, 16 }
  0x91   : > { %v2039_v15 = vsel %vm4291_vm3, %v2034_v5, %v2038_v51  ;;  %v2346_v17 = vrot.slane %v2344_v4, 5  ;;  %v2349_v21 = vrot.slane %v2347_v6, 6  ;;  %v2356_v25 = vshll.u32 %v4769_v58, 16  ;;  %v4812_v6 = vld [vmem:[%s4264_s30 + $0x38] sm:$0xe] }
  0x92   : > { %v3732_v18 = vcombine.low %v2025_v61, %v2039_v15  ;;  %v2333_v30 = vsel %vm4370_vm8, %v2324_v9, %v2332_v1  ;;  %v2341_v22 = vor.u32 %v2340_v12, %v2337_v11  ;;  %v2355_v28 = vrot.slane %v2353_v48, 5  ;;  %v3770_v12 = vld [vmem:[%s4264_s30 + $0x3c] sm:$0x3] }
  0x93   : > { %v2350_v50 = vor.u32 %v2349_v21, %v2346_v17  ;;  %v2358_v31 = vrot.slane %v2356_v25, 6  ;;  %v2362_v24 = vshrl.u32 %v3767_v0, 16  ;;  %v2365_v13 = vshll.u32 %v3767_v0, 16  ;;  %v3769_v0 = vld [vmem:[%s4264_s30 + $0x34] sm:$0x3]  ;;  %v4829_v21 = vld [vmem:[%s5196_s1 + $0x78] sm:$0xff]  }
  0x94   : > { %4055 = vmatmul.mubr.msk.bf16.gmra.mxu1 %vm405_vm1, %v3732_v18  ;;  %v2342_v23 = vrot.slane %v2341_v22, 4  ;;  %v2371_v27 = vshrl.u32 %v4778_v7, 16  ;;  %v2374_v33 = vshll.u32 %v4778_v7, 16  ;;  %v2380_v14 = vshrl.u32 %v3768_v36, 16  ;;  %v4824_v17 = vld [vmem:[%s4264_s30 + $0x40] sm:$0xe] }
  0x95   : > { %v2359_v8 = vor.u32 %v2358_v31, %v2355_v28  ;;  %v2364_v16 = vrot.slane %v2362_v24, 5  ;;  %v2367_v38 = vrot.slane %v2365_v13, 6  ;;  %v2383_v39 = vshll.u32 %v3768_v36, 16  ;;  %v4836_v28 = vld [vmem:[%s5196_s1 + $0x70] sm:$0xff]  }
  0x96   : > { %v2351_v19 = vsel %vm4370_vm8, %v2342_v23, %v2350_v50  ;;  %v2373_v51 = vrot.slane %v2371_v27, 5  ;;  %v2376_v43 = vrot.slane %v2374_v33, 6  ;;  %v2382_v2 = vrot.slane %v2380_v14, 5  ;;  %v3771_v23 = vld [vmem:[%s4264_s30 + $0x44] sm:$0x3] }
  0x97   : > { %v3775_v40 = vcombine.low %v2333_v30, %v2351_v19  ;;  %v2360_v45 = vrot.slane %v2359_v8, 4  ;;  %v2368_v3 = vor.u32 %v2367_v38, %v2364_v16  ;;  %v2385_v52 = vrot.slane %v2383_v39, 6  ;;  %v4844_v14 = vld [vmem:[%s4264_s30 + $0x48] sm:$0xe] }
  0x98   : > { %v2377_v32 = vor.u32 %v2376_v43, %v2373_v51  ;;  %v3746_v35 = vrot.slane %v4740_v37, 9  ;;  %v2172_v44 = vrot.slane %v4669_v47, 5  ;;  %v3747_v55 = vrot.slane %v4761_v20, 9 }
  0x99   : > { %4070 = vmatprep.mubr.msk.bf16.mxu1 %vm405_vm1, %v3775_v40  ;;  %v2369_v61 = vsel %vm4370_vm8, %v2360_v45, %v2368_v3  ;;  %v2386_v60 = vor.u32 %v2385_v52, %v2382_v2  ;;  %v2176_v62 = vrot.slane %v4679_v53, 5  ;;  %v3748_v63 = vrot.slane %v4769_v58, 9  ;;  %v3772_v2 = vld [vmem:[%s4264_s30 + $0x4c] sm:$0x3] }
  0x9a   : > { %v2378_v37 = vrot.slane %v2377_v32, 4  ;;  %v2173_v47 = vsel %vm4383_vm9, %v3746_v35, %v2172_v44  ;;  %v2180_v20 = vrot.slane %v4688_v26, 5  ;;  %v3749_v5 = vrot.slane %v4778_v7, 9 }
  0x9b   : > { %v2177_v1 = vsel %vm4383_vm9, %v3747_v55, %v2176_v62  ;;  %v2184_v4 = vrot.slane %v4698_v56, 5  ;;  %v2389_v53 = vshrl.u32 %v4796_v57, 16  ;;  %v2392_v58 = vshll.u32 %v4796_v57, 16 }
  0x9c   : > { %v2387_v9 = vsel %vm4370_vm8, %v2378_v37, %v2386_v60  ;;  %v3756_v11 = vcombine.low %v2173_v47, %v2177_v1  ;;  %v2181_v26 = vsel %vm4383_vm9, %v3748_v63, %v2180_v20  ;;  %v2398_v7 = vshrl.u32 %v3769_v0, 16 }
  0x9d   : > { %v3776_v36 = vcombine.low %v2369_v61, %v2387_v9  ;;  %v2185_v48 = vsel %vm4383_vm9, %v3749_v5, %v2184_v4  ;;  %v2391_v56 = vrot.slane %v2389_v53, 5  ;;  %v2394_v15 = vrot.slane %v2392_v58, 6 }
  0x9e   : > { %4060 = vmatprep.mubr.msk.bf16.mxu0 %vm405_vm1, %v3756_v11  ;;  %v3757_v25 = vcombine.low %v2181_v26, %v2185_v48  ;;  %v2400_v18 = vrot.slane %v2398_v7, 5  ;;  %v2401_v30 = vshll.u32 %v3769_v0, 16  ;;  %v2407_v22 = vshrl.u32 %v4812_v6, 16  ;;  %v3803_v7 = vld [vmem:[%s4264_s30 + $0x18] sm:$0xf] }
  0x9f   : > { %4071 = vmatmul.mubr.msk.bf16.vlgmr.msra.gmra.mxu1 %vm405_vm1, %v3776_v36  ;;  %v2395_v50 = vor.u32 %v2394_v15, %v2391_v56  ;;  %v2410_v31 = vshll.u32 %v4812_v6, 16  ;;  %v2416_v24 = vshrl.u32 %v3770_v12, 16  ;;  %v2419_v13 = vshll.u32 %v3770_v12, 16  ;;  %v4869_v15 = vld [vmem:[%s4264_s30 + $0x1c] sm:$0x1] }
  0xa0   : > { %4061 = vmatmul.mubr.msk.bf16.vlgmr.msra.gmra.mxu0 %vm405_vm1, %v3757_v25  ;;  %4089 = vmatpush3.bf16.msra.mxu1 %v4749_v59  ;;  %v2403_v27 = vrot.slane %v2401_v30, 6  ;;  %v2409_v33 = vrot.slane %v2407_v22, 5  ;;  %v2425_v8 = vshrl.u32 %v4824_v17, 16  ;;  %v2428_v16 = vshll.u32 %v4824_v17, 16  ;;  %v3805_v30 = vld [vmem:[%s4264_s30 + $0x20] sm:$0xf] }
  0xa1   : > { %4079 = vmatpush3.bf16.msra.mxu0 %v4724_v54  ;;  %v2396_v38 = vrot.slane %v2395_v50, 4  ;;  %v2412_v39 = vrot.slane %v2410_v31, 6  ;;  %v2418_v19 = vrot.slane %v2416_v24, 5  ;;  %v2421_v51 = vrot.slane %v2419_v13, 6  ;;  %4108 = vmatprep.subr.bf16.mxu1 %v4829_v21 }
  0xa2   : > { %v2404_v43 = vor.u32 %v2403_v27, %v2400_v18  ;;  %v2427_v40 = vrot.slane %v2425_v8, 5  ;;  %v2430_v59 = vrot.slane %v2428_v16, 6  ;;  %v2434_v45 = vshrl.u32 %v3771_v23, 16  ;;  %4098 = vmatprep.subr.bf16.mxu0 %v4836_v28  ;;  %v3807_v27 = vld [vmem:[%s4264_s30 + $0x28] sm:$0xf] }
  0xa3   : > { %v2413_v3 = vor.u32 %v2412_v39, %v2409_v33  ;;  %v2422_v52 = vor.u32 %v2421_v51, %v2418_v19  ;;  %v2437_v32 = vshll.u32 %v3771_v23, 16  ;;  %v2443_v35 = vshrl.u32 %v4844_v14, 16  ;;  %v4888_v33 = vld [vmem:[%s4264_s30 + $0x2c] sm:$0x1]  ;;  %v4170_v39 = vld [vmem:[%s4264_s30 + $0x18] ss:$8 sps:$4 sm:$0xff]  }
  0xa4   : > { %v2405_v54 = vsel %vm4370_vm8, %v2396_v38, %v2404_v43  ;;  %v2431_v44 = vor.u32 %v2430_v59, %v2427_v40  ;;  %v2436_v55 = vrot.slane %v2434_v45, 5  ;;  %v2446_v61 = vshll.u32 %v4844_v14, 16  ;;  %v3809_v38 = vld [vmem:[%s4264_s30 + $0x30] sm:$0xf]  ;;  %v4898_v45 = vld [vmem:[%s4264_s30 + $0x34] sm:$0x1] }
  0xa5   : > { %v2414_v60 = vrot.slane %v2413_v3, 4  ;;  %v2439_v62 = vrot.slane %v2437_v32, 6  ;;  %v2445_v63 = vrot.slane %v2443_v35, 5  ;;  %v2452_v0 = vshrl.u32 %v3772_v2, 16 }
  0xa6   : > { %v2432_v37 = vrot.slane %v2431_v44, 4  ;;  %v2448_v47 = vrot.slane %v2446_v61, 6  ;;  %v2455_v20 = vshll.u32 %v3772_v2, 16  ;;  %v3750_v5 = vrot.slane %v4796_v57, 9 }
  0xa7   : > { %v2423_v1 = vsel %vm4370_vm8, %v2414_v60, %v2422_v52  ;;  %v2440_v4 = vor.u32 %v2439_v62, %v2436_v55  ;;  %v2454_v53 = vrot.slane %v2452_v0, 5  ;;  %v2188_v58 = vrot.slane %v4705_v29, 5  ;;  %v3811_v55 = vld [vmem:[%s4264_s30 + $0x38] sm:$0xf]  ;;  %v4905_v0 = vld [vmem:[%s4264_s30 + $0x3c] sm:$0x1] }
  0xa8   : > { %v3777_v9 = vcombine.low %v2405_v54, %v2423_v1  ;;  %v2449_v11 = vor.u32 %v2448_v47, %v2445_v63  ;;  %v2457_v26 = vrot.slane %v2455_v20, 6  ;;  %v3751_v12 = vrot.slane %v4812_v6, 9  ;;  %v3813_v1 = vld [vmem:[%s4264_s30 + $0x40] sm:$0xf] }
  0xa9   : > { %v2441_v36 = vsel %vm4370_vm8, %v2432_v37, %v2440_v4  ;;  %v2189_v57 = vsel %vm4383_vm9, %v3750_v5, %v2188_v58  ;;  %v2192_v48 = vrot.slane %v4713_v41, 5  ;;  %v3752_v56 = vrot.slane %v4824_v17, 9  ;;  %v4879_v17 = vld [vmem:[%s4264_s30 + $0x24] sm:$0x1] }
  0xaa   : > { %4074 = vmatprep.mubr.msk.bf16.mxu1 %vm405_vm1, %v3777_v9  ;;  %v2450_v29 = vrot.slane %v2449_v11, 4  ;;  %v2458_v25 = vor.u32 %v2457_v26, %v2454_v53  ;;  %v2196_v6 = vrot.slane %v4718_v46, 5  ;;  %v3753_v18 = vrot.slane %v4844_v14, 9  ;;  %v4172_v9 = vld [vmem:[%s4264_s30 + $0x28] ss:$8 sps:$4 sm:$0xff]  }
  0xab   : > { %v2193_v22 = vsel %vm4383_vm9, %v3751_v12, %v2192_v48  ;;  %v2200_v41 = vrot.slane %v4732_v42, 5  ;;  %v2706_v50 = vshrl.u32 %v3803_v7, 16  ;;  %v2709_v31 = vshll.u32 %v3803_v7, 16  ;;  %v4913_v11 = vld [vmem:[%s4264_s30 + $0x44] sm:$0x1] }
  0xac   : > { %v2459_v24 = vsel %vm4370_vm8, %v2450_v29, %v2458_v25  ;;  %v3758_v13 = vcombine.low %v2189_v57, %v2193_v22  ;;  %v2197_v46 = vsel %vm4383_vm9, %v3752_v56, %v2196_v6  ;;  %v2715_v23 = vshll.u32 %v4869_v15, 16  ;;  %v3815_v48 = vld [vmem:[%s4264_s30 + $0x48] sm:$0xf] }
  0xad   : > { %v3778_v14 = vcombine.low %v2441_v36, %v2459_v24  ;;  %v2201_v42 = vsel %vm4383_vm9, %v3753_v18, %v2200_v41  ;;  %v2708_v8 = vrot.slane %v2706_v50, 4  ;;  %v2711_v16 = vrot.slane %v2709_v31, 5  ;;  %v4918_v18 = vld [vmem:[%s4264_s30 + $0x4c] sm:$0x1]  ;;  %v3817_v31 = vld [vmem:[%s4264_s30 + $0x50] sm:$0xf] }
  0xae   : > { %4064 = vmatprep.mubr.msk.bf16.mxu0 %vm405_vm1, %v3758_v13  ;;  %v3759_v19 = vcombine.low %v2197_v46, %v2201_v42  ;;  %v2717_v51 = vrot.slane %v2715_v23, 5  ;;  %v2720_v43 = vshrl.u32 %v3805_v30, 16  ;;  %v2723_v2 = vshll.u32 %v3805_v30, 16  ;;  %v4174_v24 = vld [vmem:[%s4264_s30 + $0x38] ss:$8 sps:$4 sm:$0xff]  }
  0xaf   : > { %4075 = vmatmul.mubr.msk.bf16.gmra.mxu1 %vm405_vm1, %v3778_v14  ;;  %v2712_v40 = vor.u32 %v2711_v16, %v2708_v8  ;;  %v2729_v59 = vshll.u32 %v4879_v17, 16  ;;  %v2734_v3 = vshrl.u32 %v3807_v27, 16  ;;  %v2737_v52 = vshll.u32 %v3807_v27, 16 }
  0xb0   : > { %4065 = vmatmul.mubr.msk.bf16.gmra.mxu0 %vm405_vm1, %v3759_v19  ;;  %v2722_v32 = vrot.slane %v2720_v43, 4  ;;  %v2725_v35 = vrot.slane %v2723_v2, 5  ;;  %v2743_v54 = vshll.u32 %v4888_v33, 16  ;;  %v2748_v44 = vshrl.u32 %v3809_v38, 16 }
  0xb1   : > { %v2713_v61 = vrot.slane %v2712_v40, 4  ;;  %v2731_v60 = vrot.slane %v2729_v59, 5  ;;  %v2736_v62 = vrot.slane %v2734_v3, 4  ;;  %v2739_v63 = vrot.slane %v2737_v52, 5  ;;  %4080 = vmatprep.mubr.msk.bf16.mxu0 %vm405_vm1, %v4170_v39  ;;  %v4931_v39 = vld [vmem:[%s4264_s30 + $0x54] sm:$0x1] }
  0xb2   : > { %v2726_v37 = vor.u32 %v2725_v35, %v2722_v32  ;;  %v2745_v47 = vrot.slane %v2743_v54, 5  ;;  %v2750_v20 = vrot.slane %v2748_v44, 4  ;;  %v2751_v5 = vshll.u32 %v3809_v38, 16  ;;  %v4938_v52 = vld [vmem:[%s4264_s30 + $0x18] sm:$0xe] }
  0xb3   : > { %v2718_v4 = vsel %vm4291_vm3, %v2713_v61, %v2717_v51  ;;  %v2740_v53 = vor.u32 %v2739_v63, %v2736_v62  ;;  %v2757_v58 = vshll.u32 %v4898_v45, 16  ;;  %v2762_v26 = vshrl.u32 %v3811_v55, 16  ;;  %v3857_v44 = vld [vmem:[%s4264_s30 + $0x1c] sm:$0x3]  ;;  %v4175_v63 = vld [vmem:[%s4264_s30 + $0x48] ss:$8 sps:$4 sm:$0xff]  }
  0xb4   : > { %v2727_v12 = vrot.slane %v2726_v37, 4  ;;  %v2753_v7 = vrot.slane %v2751_v5, 5  ;;  %v2765_v36 = vshll.u32 %v3811_v55, 16  ;;  %v2771_v57 = vshll.u32 %v4905_v0, 16 }
  0xb5   : > { %v2741_v56 = vrot.slane %v2740_v53, 4  ;;  %v2759_v29 = vrot.slane %v2757_v58, 5  ;;  %v2764_v25 = vrot.slane %v2762_v26, 4  ;;  %v2776_v6 = vshrl.u32 %v3813_v1, 16  ;;  %v4950_v53 = vld [vmem:[%s4264_s30 + $0x20] sm:$0xe] }
  0xb6   : > { %v2732_v30 = vsel %vm4291_vm3, %v2727_v12, %v2731_v60  ;;  %v2754_v22 = vor.u32 %v2753_v7, %v2750_v20  ;;  %v2767_v41 = vrot.slane %v2765_v36, 5  ;;  %v2773_v50 = vrot.slane %v2771_v57, 5  ;;  %v3858_v7 = vld [vmem:[%s4264_s30 + $0x24] sm:$0x3] }
  0xb7   : > { %v3821_v13 = vcombine.low %v2718_v4, %v2732_v30  ;;  %v2746_v46 = vsel %vm4291_vm3, %v2741_v56, %v2745_v47  ;;  %v2778_v23 = vrot.slane %v2776_v6, 4  ;;  %v2779_v27 = vshll.u32 %v3813_v1, 16 }
  0xb8   : > { %v2755_v14 = vrot.slane %v2754_v22, 4  ;;  %4081 = vmatmul.mubr.msk.bf16.vlgmr.msra.gmra.mxu0 %vm405_vm1, %v4172_v9  ;;  %v2768_v42 = vor.u32 %v2767_v41, %v2764_v25  ;;  %v2785_v8 = vshll.u32 %v4913_v11, 16  ;;  %v2790_v16 = vshrl.u32 %v3815_v48, 16  ;;  %v4957_v25 = vld [vmem:[%s4264_s30 + $0x28] sm:$0xe] }
  0xb9   : > { %4090 = vmatprep.mubr.msk.bf16.mxu1 %vm405_vm1, %v3821_v13  ;;  %4099 = vmatpush3.bf16.msra.mxu0 %v4836_v28  ;;  %v2781_v38 = vrot.slane %v2779_v27, 5  ;;  %v2793_v19 = vshll.u32 %v3815_v48, 16  ;;  %v2799_v51 = vshll.u32 %v4918_v18, 16  ;;  %v2804_v43 = vshrl.u32 %v3817_v31, 16 }
  0xba   : > { %v2760_v2 = vsel %vm4291_vm3, %v2755_v14, %v2759_v29  ;;  %v2769_v40 = vrot.slane %v2768_v42, 4  ;;  %v2787_v59 = vrot.slane %v2785_v8, 5  ;;  %v2792_v3 = vrot.slane %v2790_v16, 4  ;;  %4084 = vmatprep.mubr.msk.bf16.mxu0 %vm405_vm1, %v4174_v24  ;;  %v3859_v42 = vld [vmem:[%s4264_s30 + $0x2c] sm:$0x3] }
  0xbb   : > { %v3822_v28 = vcombine.low %v2746_v46, %v2760_v2  ;;  %v2782_v32 = vor.u32 %v2781_v38, %v2778_v23  ;;  %v2795_v35 = vrot.slane %v2793_v19, 5  ;;  %v2801_v54 = vrot.slane %v2799_v51, 5  ;;  %v4965_v46 = vld [vmem:[%s4264_s30 + $0x30] sm:$0xe]  ;;  %v3860_v51 = vld [vmem:[%s4264_s30 + $0x34] sm:$0x3] }
  0xbc   : > { %v2774_v55 = vsel %vm4291_vm3, %v2769_v40, %v2773_v50  ;;  %v2806_v61 = vrot.slane %v2804_v43, 4  ;;  %v2807_v60 = vshll.u32 %v3817_v31, 16  ;;  %v2813_v62 = vshll.u32 %v4931_v39, 16 }
  0xbd   : > { %4091 = vmatmul.mubr.msk.bf16.vlgmr.msra.gmra.mxu1 %vm405_vm1, %v3822_v28  ;;  %v2783_v37 = vrot.slane %v2782_v32, 4  ;;  %v2796_v47 = vor.u32 %v2795_v35, %v2792_v3  ;;  %v3094_v20 = vshrl.u32 %v4938_v52, 16  ;;  %v3097_v5 = vshll.u32 %v4938_v52, 16 }
  0xbe   : > { %4109 = vmatpush3.bf16.msra.mxu1 %v4829_v21  ;;  %v2809_v1 = vrot.slane %v2807_v60, 5  ;;  %v2815_v4 = vrot.slane %v2813_v62, 5  ;;  %v3103_v58 = vshrl.u32 %v3857_v44, 16  ;;  %v3106_v9 = vshll.u32 %v3857_v44, 16 }
  0xbf   : > { %v2788_v26 = vsel %vm4291_vm3, %v2783_v37, %v2787_v59  ;;  %v2797_v12 = vrot.slane %v2796_v47, 4  ;;  %v3096_v36 = vrot.slane %v3094_v20, 5  ;;  %v3099_v57 = vrot.slane %v3097_v5, 6 }
  0xc0   : > { %v3823_v48 = vcombine.low %v2774_v55, %v2788_v26  ;;  %v2810_v56 = vor.u32 %v2809_v1, %v2806_v61  ;;  %4085 = vmatmul.mubr.msk.bf16.gmra.mxu0 %vm405_vm1, %v4175_v63  ;;  %v3105_v21 = vrot.slane %v3103_v58, 5  ;;  %v3108_v29 = vrot.slane %v3106_v9, 6 }
  0xc1   : > { %v2802_v6 = vsel %vm4291_vm3, %v2797_v12, %v2801_v54  ;;  %v3100_v30 = vor.u32 %v3099_v57, %v3096_v36  ;;  %v3112_v22 = vshrl.u32 %v4950_v53, 16  ;;  %v3115_v41 = vshll.u32 %v4950_v53, 16 }
  0xc2   : > { %4094 = vmatprep.mubr.msk.bf16.mxu1 %vm405_vm1, %v3823_v48  ;;  %v2811_v50 = vrot.slane %v2810_v56, 4  ;;  %v3109_v31 = vor.u32 %v3108_v29, %v3105_v21  ;;  %v3121_v24 = vshrl.u32 %v3858_v7, 16  ;;  %v3124_v13 = vshll.u32 %v3858_v7, 16 }
  0xc3   : > { %v3101_v23 = vrot.slane %v3100_v30, 4  ;;  %v3114_v27 = vrot.slane %v3112_v22, 5  ;;  %v3117_v14 = vrot.slane %v3115_v41, 6  ;;  %v3130_v8 = vshrl.u32 %v4957_v25, 16 }
  0xc4   : > { %v2816_v16 = vsel %vm4291_vm3, %v2811_v50, %v2815_v4  ;;  %v3123_v38 = vrot.slane %v3121_v24, 5  ;;  %v3126_v19 = vrot.slane %v3124_v13, 6  ;;  %v3133_v43 = vshll.u32 %v4957_v25, 16 }
  0xc5   : > { %v3824_v2 = vcombine.low %v2802_v6, %v2816_v16  ;;  %v3110_v40 = vsel %vm4370_vm8, %v3101_v23, %v3109_v31  ;;  %v3118_v59 = vor.u32 %v3117_v14, %v3114_v27  ;;  %v3132_v3 = vrot.slane %v3130_v8, 5 }
  0xc6   : > { %v3127_v28 = vor.u32 %v3126_v19, %v3123_v38  ;;  %v3135_v32 = vrot.slane %v3133_v43, 6  ;;  %v3139_v35 = vshrl.u32 %v3859_v42, 16  ;;  %v3142_v54 = vshll.u32 %v3859_v42, 16  ;;  %v3861_v42 = vld [vmem:[%s4264_s30 + $0x3c] sm:$0x3] }
  0xc7   : > { %4095 = vmatmul.mubr.msk.bf16.gmra.mxu1 %vm405_vm1, %v3824_v2  ;;  %v3119_v44 = vrot.slane %v3118_v59, 4  ;;  %v3148_v34 = vshrl.u32 %v4965_v46, 16  ;;  %v3151_v55 = vshll.u32 %v4965_v46, 16  ;;  %v3157_v61 = vshrl.u32 %v3860_v51, 16 }
  0xc8   : > { %v3136_v60 = vor.u32 %v3135_v32, %v3132_v3  ;;  %v3141_v62 = vrot.slane %v3139_v35, 5  ;;  %v3144_v63 = vrot.slane %v3142_v54, 6  ;;  %v3160_v37 = vshll.u32 %v3860_v51, 16  ;;  %v3862_v3 = vld [vmem:[%s4264_s30 + $0x44] sm:$0x3] }
  0xc9   : > { %v3128_v47 = vsel %vm4370_vm8, %v3119_v44, %v3127_v28  ;;  %v3150_v20 = vrot.slane %v3148_v34, 5  ;;  %v3153_v5 = vrot.slane %v3151_v55, 6  ;;  %v3159_v1 = vrot.slane %v3157_v61, 5 }
  0xca   : > { %v3867_v4 = vcombine.low %v3110_v40, %v3128_v47  ;;  %v3137_v58 = vrot.slane %v3136_v60, 4  ;;  %v3145_v9 = vor.u32 %v3144_v63, %v3141_v62  ;;  %v3162_v26 = vrot.slane %v3160_v37, 6  ;;  %v3863_v60 = vld [vmem:[%s4264_s30 + $0x4c] sm:$0x3] }
  0xcb   : > { %v3154_v12 = vor.u32 %v3153_v5, %v3150_v20  ;;  %v3838_v7 = vrot.slane %v4938_v52, 9  ;;  %v2949_v36 = vrot.slane %v4869_v15, 5  ;;  %v3839_v57 = vrot.slane %v4950_v53, 9  ;;  %v3834_v53 = vld [vmem:[%s4264_s30 + $0x38] sm:$0xe] }
  0xcc   : > { %4110 = vmatprep.mubr.msk.bf16.mxu1 %vm405_vm1, %v3867_v4  ;;  %v3146_v48 = vsel %vm4370_vm8, %v3137_v58, %v3145_v9  ;;  %v3163_v56 = vor.u32 %v3162_v26, %v3159_v1  ;;  %v2953_v21 = vrot.slane %v4879_v17, 5  ;;  %v3840_v29 = vrot.slane %v4957_v25, 9  ;;  %v3835_v17 = vld [vmem:[%s4264_s30 + $0x40] sm:$0xe] }
  0xcd   : > { %v3155_v6 = vrot.slane %v3154_v12, 4  ;;  %v2950_v30 = vsel %vm4383_vm9, %v3838_v7, %v2949_v36  ;;  %v2957_v52 = vrot.slane %v4888_v33, 5  ;;  %v3841_v15 = vrot.slane %v4965_v46, 9  ;;  %v3836_v46 = vld [vmem:[%s4264_s30 + $0x48] sm:$0xe] }
  0xce   : > { %v2954_v22 = vsel %vm4383_vm9, %v3839_v57, %v2953_v21  ;;  %v2961_v41 = vrot.slane %v4898_v45, 5  ;;  %v3842_v50 = vrot.slane %v3834_v53, 9  ;;  %v2965_v25 = vrot.slane %v4905_v0, 5  ;;  %v3837_v0 = vld [vmem:[%s4264_s30 + $0x50] sm:$0xe] }
  0xcf   : > { %v3164_v31 = vsel %vm4370_vm8, %v3155_v6, %v3163_v56  ;;  %v3848_v24 = vcombine.low %v2950_v30, %v2954_v22  ;;  %v2958_v33 = vsel %vm4383_vm9, %v3840_v29, %v2957_v52  ;;  %v3843_v13 = vrot.slane %v3835_v17, 9  ;;  %v3864_v7 = vld [vmem:[%s4264_s30 + $0x54] sm:$0x3] }
  0xd0   : > { %v3868_v23 = vcombine.low %v3146_v48, %v3164_v31  ;;  %v2962_v27 = vsel %vm4383_vm9, %v3841_v15, %v2961_v41  ;;  %v2966_v45 = vsel %vm4383_vm9, %v3842_v50, %v2965_v25  ;;  %v2969_v14 = vrot.slane %v4913_v11, 5 }
  0xd1   : > { %4100 = vmatprep.mubr.msk.bf16.mxu0 %vm405_vm1, %v3848_v24  ;;  %v3849_v8 = vcombine.low %v2958_v33, %v2962_v27  ;;  %v3844_v16 = vrot.slane %v3836_v46, 9  ;;  %v2973_v38 = vrot.slane %v4918_v18, 5  ;;  %v3845_v19 = vrot.slane %v3837_v0, 9 }
  0xd2   : > { %4111 = vmatmul.mubr.msk.bf16.vlgmr.msra.gmra.mxu1 %vm405_vm1, %v3868_v23  ;;  %v2970_v51 = vsel %vm4383_vm9, %v3843_v13, %v2969_v14  ;;  %v2977_v43 = vrot.slane %v4931_v39, 5  ;;  %v3166_v2 = vshrl.u32 %v3834_v53, 16  ;;  %v3169_v40 = vshll.u32 %v3834_v53, 16 }
  0xd3   : > { %4101 = vmatmul.mubr.msk.bf16.vlgmr.msra.gmra.mxu0 %vm405_vm1, %v3849_v8  ;;  %v3850_v11 = vcombine.low %v2966_v45, %v2970_v51  ;;  %v2974_v59 = vsel %vm4383_vm9, %v3844_v16, %v2973_v38  ;;  %v3175_v28 = vshrl.u32 %v3861_v42, 16  ;;  %v3178_v18 = vshll.u32 %v3861_v42, 16 }
  0xd4   : > { %v2978_v32 = vsel %vm4383_vm9, %v3845_v19, %v2977_v43  ;;  %v3168_v35 = vrot.slane %v3166_v2, 5  ;;  %v3171_v54 = vrot.slane %v3169_v40, 6  ;;  %v3184_v44 = vshrl.u32 %v3835_v17, 16 }
  0xd5   : > { %4104 = vmatprep.mubr.msk.bf16.mxu0 %vm405_vm1, %v3850_v11  ;;  %v3851_v39 = vcombine.low %v2974_v59, %v2978_v32  ;;  %v3177_v34 = vrot.slane %v3175_v28, 5  ;;  %v3180_v55 = vrot.slane %v3178_v18, 6  ;;  %v3187_v61 = vshll.u32 %v3835_v17, 16 }
  0xd6   : > { %v3172_v62 = vor.u32 %v3171_v54, %v3168_v35  ;;  %v3186_v63 = vrot.slane %v3184_v44, 5  ;;  %v3193_v37 = vshrl.u32 %v3862_v3, 16  ;;  %v3196_v47 = vshll.u32 %v3862_v3, 16 }
  0xd7   : > { %v3181_v20 = vor.u32 %v3180_v55, %v3177_v34  ;;  %v3189_v5 = vrot.slane %v3187_v61, 6  ;;  %v3202_v1 = vshrl.u32 %v3836_v46, 16  ;;  %v3205_v49 = vshll.u32 %v3836_v46, 16 }
  0xd8   : > { %v3173_v4 = vrot.slane %v3172_v62, 4  ;;  %v3195_v58 = vrot.slane %v3193_v37, 5  ;;  %v3198_v9 = vrot.slane %v3196_v47, 6  ;;  %v3211_v26 = vshrl.u32 %v3863_v60, 16 }
  0xd9   : > { %v3190_v12 = vor.u32 %v3189_v5, %v3186_v63  ;;  %v3204_v36 = vrot.slane %v3202_v1, 5  ;;  %v3207_v57 = vrot.slane %v3205_v49, 6  ;;  %v3214_v48 = vshll.u32 %v3863_v60, 16  ;;  %v3972_v56 = vpop.f32.mrf.mxu1 }
  0xda   : > { %v3182_v21 = vsel %vm4370_vm8, %v3173_v4, %v3181_v20  ;;  %v3199_v29 = vor.u32 %v3198_v9, %v3195_v58  ;;  %v3213_v6 = vrot.slane %v3211_v26, 5  ;;  %v3220_v30 = vshrl.u32 %v3837_v0, 16 }
  0xdb   : > { %4105 = vmatmul.mubr.msk.bf16.gmra.mxu0 %vm405_vm1, %v3851_v39  ;;  %v3191_v52 = vrot.slane %v3190_v12, 4  ;;  %v3208_v15 = vor.u32 %v3207_v57, %v3204_v36  ;;  %v3216_v53 = vrot.slane %v3214_v48, 6  ;;  %v3223_v22 = vshll.u32 %v3837_v0, 16  ;;  %v555_v41 = vpop.f32.mrf.mxu1 }
  0xdc   : > { %v3222_v17 = vrot.slane %v3220_v30, 5  ;;  %v3229_v50 = vshrl.u32 %v3864_v7, 16  ;;  %v3232_v25 = vshll.u32 %v3864_v7, 16 }
  0xdd   : > { %v3200_v31 = vsel %vm4370_vm8, %v3191_v52, %v3199_v29  ;;  %v3209_v24 = vrot.slane %v3208_v15, 4  ;;  %v3217_v33 = vor.u32 %v3216_v53, %v3213_v6  ;;  %v3225_v13 = vrot.slane %v3223_v22, 6  ;;  %v3973_v45 = vpop.f32.mrf.mxu1 }
  0xde   : > { %v3869_v46 = vcombine.low %v3182_v21, %v3200_v31  ;;  %v3231_v23 = vrot.slane %v3229_v50, 5  ;;  %v3234_v27 = vrot.slane %v3232_v25, 6 }
  0xdf   : > { %v3226_v14 = vor.u32 %v3225_v13, %v3222_v17  ;;  %v3218_v0 = vsel %vm4370_vm8, %v3209_v24, %v3217_v33  ;;  %v558_v19 = vpop.f32.mrf.mxu1 }
  0xe0   : > { %4114 = vmatprep.mubr.msk.bf16.mxu1 %vm405_vm1, %v3869_v46  ;;  %v3235_v42 = vor.u32 %v3234_v27, %v3231_v23 }
  0xe1   : > { %v3227_v8 = vrot.slane %v3226_v14, 4  ;;  %v3962_v16 = vpop.f32.mrf.mxu0 }
  0xe2   : > { %v564_v38 = vadd.f32 %v3972_v56, %v3962_v16 }
  0xe3   : > { %v3236_v51 = vsel %vm4370_vm8, %v3227_v8, %v3235_v42  ;;  %v452_v43 = vpop.f32.mrf.mxu0  ;;  %v3976_v3 = vpop.f32.mrf.mxu1 }
  0xe4   : > { %v3870_v2 = vcombine.low %v3218_v0, %v3236_v51  ;;  %v556_v40 = vadd.f32 %v555_v41, %v452_v43 }
  0xe5   : > { %v3963_v11 = vpop.f32.mrf.mxu0  ;;  %v571_v32 = vpop.f32.mrf.mxu1 }
  0xe6   : > { %4115 = vmatmul.mubr.msk.bf16.gmra.mxu1 %vm405_vm1, %v3870_v2  ;;  %v567_v59 = vadd.f32 %v3973_v45, %v3963_v11 }
  0xe7   : > { %v455_v28 = vpop.f32.mrf.mxu0  ;;  %v3977_v44 = vpop.f32.mrf.mxu1 }
  0xe8   : > { %v559_v18 = vadd.f32 %v558_v19, %v455_v28 }
  0xe9   : > { %v574_v10 = vpop.f32.mrf.mxu1 }
  0xec   : > { %v3966_v35 = vpop.f32.mrf.mxu0 }
  0xed   : > { %v580_v54 = vadd.f32 %v3976_v3, %v3966_v35 }
  0xee   : > { %v468_v39 = vpop.f32.mrf.mxu0 }
  0xef   : > { %v572_v34 = vadd.f32 %v571_v32, %v468_v39 }
  0xf0   : > { %v3967_v55 = vpop.f32.mrf.mxu0 }
  0xf1   : > { %v583_v61 = vadd.f32 %v3977_v44, %v3967_v55 }
  0xf2   : > { %v471_v60 = vpop.f32.mrf.mxu0 }
  0xf3   : > { %v575_v62 = vadd.f32 %v574_v10, %v471_v60 }
  0xf9   : > { %v3982_v63 = vpop.f32.mrf.mxu0 }
  0xfa   : > { %v3992_v37 = vpop.f32.mrf.mxu1  ;;  %v745_v47 = vadd.f32 %v3982_v63, %v564_v38 }
  0xfb   : > { %v712_v20 = vpop.f32.mrf.mxu0 }
  0xfc   : > { %v973_v5 = vpop.f32.mrf.mxu1  ;;  %v743_v1 = vadd.f32 %v712_v20, %v556_v40  ;;  %v1006_v49 = vadd.f32 %v3992_v37, %v745_v47 }
  0xfd   : > { %v3983_v4 = vpop.f32.mrf.mxu0 }
  0xfe   : > { %v3993_v58 = vpop.f32.mrf.mxu1  ;;  %v746_v9 = vadd.f32 %v3983_v4, %v567_v59  ;;  %v5036_v26 = vadd.f32 %v973_v5, %v743_v1 }
  0xff   : > { %v715_v12 = vpop.f32.mrf.mxu0 }
 0x100   : > { %v744_v7 = vadd.f32 %v715_v12, %v559_v18  ;;  %v1007_v36 = vadd.f32 %v3993_v58, %v746_v9  ;;  %v976_v57 = vpop.f32.mrf.mxu1 }
 0x102   : > { %v5038_v48 = vadd.f32 %v976_v57, %v744_v7 }
 0x109   : > { %v3996_v56 = vpop.f32.mrf.mxu1 }
 0x10a   : > { %v3986_v21 = vpop.f32.mrf.mxu0 }
 0x10b   : > { %v989_v29 = vpop.f32.mrf.mxu1  ;;  %v749_v6 = vadd.f32 %v3986_v21, %v580_v54 }
 0x10c   : > { %v728_v30 = vpop.f32.mrf.mxu0 }
 0x10d   : > { %v747_v52 = vadd.f32 %v728_v30, %v572_v34  ;;  %v1010_v15 = vadd.f32 %v3996_v56, %v749_v6  ;;  %v3997_v53 = vpop.f32.mrf.mxu1 }
 0x10e   : > { %v3987_v22 = vpop.f32.mrf.mxu0 }
 0x10f   : > { %v750_v41 = vadd.f32 %v3987_v22, %v583_v61  ;;  %v1008_v17 = vadd.f32 %v989_v29, %v747_v52  ;;  %v992_v24 = vpop.f32.mrf.mxu1 }
 0x110   : > { %v731_v50 = vpop.f32.mrf.mxu0 }
 0x111   : > { %v748_v25 = vadd.f32 %v731_v50, %v575_v62  ;;  %v1011_v31 = vadd.f32 %v3997_v53, %v750_v41 }
 0x112   : > { %v4002_v33 = vpop.f32.mrf.mxu0 }
 0x113   : > { %v1129_v13 = vadd.f32 %v4002_v33, %v1006_v49  ;;  %v1009_v46 = vadd.f32 %v992_v24, %v748_v25 }
 0x114   : > { %v5040_v23 = vpop.f32.mrf.mxu0 }
 0x116   : > { %v4012_v27 = vpop.f32.mrf.mxu1  ;;  %v4003_v45 = vpop.f32.mrf.mxu0 }
 0x117   : > { %v1130_v14 = vadd.f32 %v4003_v45, %v1007_v36  ;;  %v5042_v42 = vadd.f32 %v4012_v27, %v1129_v13 }
 0x118   : > { %v5044_v0 = vpop.f32.mrf.mxu1  ;;  %v5046_v8 = vpop.f32.mrf.mxu0 }
 0x11a   : > { %v4013_v16 = vpop.f32.mrf.mxu1  ;;  %v4006_v38 = vpop.f32.mrf.mxu0 }
 0x11b   : > { %v1133_v19 = vadd.f32 %v4006_v38, %v1010_v15  ;;  %v5048_v51 = vadd.f32 %v4013_v16, %v1130_v14 }
 0x11c   : > { %v1112_v43 = vpop.f32.mrf.mxu0  ;;  %v5050_v2 = vpop.f32.mrf.mxu1 }
 0x11d   : > { %v1131_v40 = vadd.f32 %v1112_v43, %v1008_v17 }
 0x11e   : > { %v4007_v11 = vpop.f32.mrf.mxu0 }
 0x11f   : > { %v1134_v59 = vadd.f32 %v4007_v11, %v1011_v31 }
 0x120   : > { %v1115_v3 = vpop.f32.mrf.mxu0 }
 0x121   : > { %v4016_v28 = vpop.f32.mrf.mxu1  ;;  %v1132_v18 = vadd.f32 %v1115_v3, %v1009_v46 }
 0x122   : > { %v1367_v32 = vadd.f32 %v4016_v28, %v1133_v19 }
 0x123   : > { %v1346_v35 = vpop.f32.mrf.mxu1 }
 0x124   : > { %v5052_v54 = vadd.f32 %v1346_v35, %v1131_v40 }
 0x125   : > { %v4017_v44 = vpop.f32.mrf.mxu1 }
 0x126   : > { %v5054_v39 = vadd.f32 %v4017_v44, %v1134_v59 }
 0x127   : > { %v1349_v34 = vpop.f32.mrf.mxu1 }
 0x128   : > { %v5056_v55 = vadd.f32 %v1349_v34, %v1132_v18 }
 0x12c   : > { %v5058_v61 = vpop.f32.mrf.mxu1 }
 0x12d   : > { %v4022_v10 = vpop.f32.mrf.mxu0 }
 0x12e   : > { %v5060_v60 = vpop.f32.mrf.mxu1 }
 0x12f   : > { %v1492_v62 = vpop.f32.mrf.mxu0 }
 0x130   : > { %v5062_v63 = vpop.f32.mrf.mxu1 }
 0x131   : > { %v4023_v37 = vpop.f32.mrf.mxu0 }
 0x132   : > { %v5064_v47 = vpop.f32.mrf.mxu1 }
 0x133   : > { %v1495_v20 = vpop.f32.mrf.mxu0 }
 0x13c   : > { %v4036_v5 = vpop.f32.mrf.mxu1 }
 0x13d   : > { %v4026_v1 = vpop.f32.mrf.mxu0 }
 0x13e   : > { %v5066_v49 = vpop.f32.mrf.mxu1  ;;  %v1529_v4 = vadd.f32 %v4026_v1, %v1367_v32  ;;  %v1127_v32 = vadd.f32 %v5040_v23, %v5036_v26  ;;  %v1526_v26 = vadd.f32 %v4023_v37, %v5048_v51 }
 0x13f   : > { %v5068_v58 = vpop.f32.mrf.mxu0 }
 0x140   : > { %v5070_v9 = vadd.f32 %v4036_v5, %v1529_v4  ;;  %v5074_v7 = vpop.f32.mrf.mxu1  ;;  %v1128_v5 = vadd.f32 %v5046_v8, %v5038_v48  ;;  %v1361_v1 = vadd.f32 %v5044_v0, %v1127_v32 }
 0x141   : > { %v5072_v12 = vpop.f32.mrf.mxu0 }
 0x142   : > { %v5078_v56 = vpop.f32.mrf.mxu1 }
 0x143   : > { %v5076_v36 = vpop.f32.mrf.mxu0 }
 0x145   : > { %v4042_v57 = vpop.f32.mrf.mxu0 }
 0x147   : > { %v1873_v21 = vpop.f32.mrf.mxu0 }
 0x149   : > { %v4043_v29 = vpop.f32.mrf.mxu0 }
 0x14a   : > { %v4052_v6 = vpop.f32.mrf.mxu1 }
 0x14b   : > { %v1876_v52 = vpop.f32.mrf.mxu0 }
 0x14c   : > { %v2107_v30 = vpop.f32.mrf.mxu1 }
 0x14d   : > { %v5080_v22 = vpop.f32.mrf.mxu0 }
 0x14e   : > { %v4053_v15 = vpop.f32.mrf.mxu1 }
 0x14f   : > { %v5084_v17 = vpop.f32.mrf.mxu0 }
 0x150   : > { %v2110_v53 = vpop.f32.mrf.mxu1 }
 0x151   : > { %v5090_v31 = vpop.f32.mrf.mxu0 }
 0x153   : > { %v5094_v33 = vpop.f32.mrf.mxu0 }
 0x154   : > { %v5082_v41 = vpop.f32.mrf.mxu1 }
 0x155   : > { %5206 = vst [vmem:[#allocation2_spill] sm:$0xff] %v5082_v41 }
 0x156   : > { %v5086_v50 = vpop.f32.mrf.mxu1 }
 0x158   : > { %v5088_v25 = vpop.f32.mrf.mxu1 }
 0x159   : > { %5207 = vst [vmem:[#allocation3_spill] sm:$0xff] %v5088_v25 }
 0x15a   : > { %v5092_v24 = vpop.f32.mrf.mxu1 }
 0x15b   : > { %5208 = vst [vmem:[#allocation4_spill] sm:$0xff] %v5092_v24 }
 0x15f   : > { %v4072_v13 = vpop.f32.mrf.mxu1 }
 0x160   : > { %v4062_v46 = vpop.f32.mrf.mxu0 }
 0x161   : > { %v2527_v27 = vpop.f32.mrf.mxu1 }
 0x162   : > { %v2269_v45 = vpop.f32.mrf.mxu0 }
 0x163   : > { %v4073_v14 = vpop.f32.mrf.mxu1 }
 0x164   : > { %v4063_v16 = vpop.f32.mrf.mxu0 }
 0x165   : > { %v2530_v38 = vpop.f32.mrf.mxu1 }
 0x166   : > { %v2272_v19 = vpop.f32.mrf.mxu0 }
 0x16f   : > { %v5096_v43 = vpop.f32.mrf.mxu1 }
 0x170   : > { %5209 = vst [vmem:[#allocation5_spill] sm:$0xff] %v5096_v43  ;;  %v5098_v40 = vpop.f32.mrf.mxu0 }
 0x171   : > { %5210 = vst [vmem:[#allocation6_spill] sm:$0xff] %v5098_v40  ;;  %v5100_v11 = vpop.f32.mrf.mxu1 }
 0x172   : > { %5211 = vst [vmem:[#allocation7_spill] sm:$0xff] %v5100_v11  ;;  %v5102_v59 = vpop.f32.mrf.mxu0  ;;  %v1523_v11 = vadd.f32 %v1492_v62, %v1361_v1  ;;  %v1784_v62 = vadd.f32 %v5062_v63, %v1526_v26 }
 0x173   : > { %v5106_v28 = vpop.f32.mrf.mxu1 }
 0x174   : > { %v5104_v3 = vpop.f32.mrf.mxu0  ;;  %5213 = vst [vmem:[#allocation9_spill] sm:$0xff] %v5106_v28  ;;  %v1525_v28 = vadd.f32 %v4022_v10, %v5042_v42  ;;  %v1907_v10 = vadd.f32 %v4043_v29, %v1784_v62 }
 0x175   : > { %5212 = vst [vmem:[#allocation8_spill] sm:$0xff] %v5104_v3  ;;  %v5112_v44 = vpop.f32.mrf.mxu1 }
 0x176   : > { %v5108_v18 = vpop.f32.mrf.mxu0  ;;  %5215 = vst [vmem:[#allocation11_spill] sm:$0xff] %v5112_v44  ;;  %v1781_v44 = vadd.f32 %v5060_v60, %v1523_v11  ;;  %v1783_v48 = vadd.f32 %v5058_v61, %v1525_v28 }
 0x177   : > { %5214 = vst [vmem:[#allocation10_spill] sm:$0xff] %v5108_v18  ;;  %v1362_v18 = vadd.f32 %v5050_v2, %v1128_v5 }
 0x178   : > { %v4082_v35 = vpop.f32.mrf.mxu0  ;;  %v1904_v0 = vadd.f32 %v1873_v21, %v1781_v44  ;;  %v1906_v8 = vadd.f32 %v4042_v57, %v1783_v48  ;;  %v2141_v21 = vadd.f32 %v4053_v15, %v1907_v10 }
 0x179   : > { %v1524_v23 = vadd.f32 %v1495_v20, %v1362_v18 }
 0x17a   : > { %v2650_v34 = vpop.f32.mrf.mxu0  ;;  %v2138_v37 = vadd.f32 %v2107_v30, %v1904_v0  ;;  %v2140_v60 = vadd.f32 %v4052_v6, %v1906_v8  ;;  %v2303_v28 = vadd.f32 %v4063_v16, %v2141_v21 }
 0x17b   : > { %v1782_v32 = vadd.f32 %v5064_v47, %v1524_v23  ;;  %v1527_v47 = vadd.f32 %v5068_v58, %v5052_v54  ;;  %v1530_v54 = vadd.f32 %v5072_v12, %v5054_v39 }
 0x17c   : > { %v4083_v4 = vpop.f32.mrf.mxu0  ;;  %v2300_v11 = vadd.f32 %v2269_v45, %v2138_v37  ;;  %v2302_v57 = vadd.f32 %v4062_v46, %v2140_v60  ;;  %v1528_v45 = vadd.f32 %v5076_v36, %v5056_v55  ;;  %v2561_v15 = vadd.f32 %v4073_v14, %v2303_v28  ;;  %v5218_v37 = vld [vmem:[#allocation6_spill] sm:$0xff] }
 0x17d   : > { %v4092_v43 = vpop.f32.mrf.mxu1  ;;  %v1905_v51 = vadd.f32 %v1876_v52, %v1782_v32  ;;  %v1785_v1 = vadd.f32 %v5066_v49, %v1527_v47  ;;  %v1910_v49 = vadd.f32 %v5080_v22, %v5070_v9  ;;  %v1788_v14 = vadd.f32 %v5074_v7, %v1530_v54  ;;  %v5216_v9 = vld [vmem:[#allocation2_spill] sm:$0xff]  ;;  %v5217_v22 = vld [vmem:[#allocation4_spill] sm:$0xff] }
 0x17e   : > { %v2653_v25 = vpop.f32.mrf.mxu0  ;;  %v2558_v5 = vadd.f32 %v2527_v27, %v2300_v11  ;;  %v2560_v52 = vadd.f32 %v4072_v13, %v2302_v57  ;;  %v2684_v16 = vadd.f32 %v4083_v4, %v2561_v15  ;;  %v5220_v11 = vld [vmem:[#allocation10_spill] sm:$0xff]  ;;  %v5221_v57 = vld [vmem:[#allocation7_spill] sm:$0xff]  ;;  %v5223_v15 = vld [vmem:[#allocation5_spill] sm:$0xff] }
 0x17f   : > { %v2884_v3 = vpop.f32.mrf.mxu1  ;;  %v2139_v63 = vadd.f32 %v2110_v53, %v1905_v51  ;;  %v1908_v58 = vadd.f32 %v5084_v17, %v1785_v1  ;;  %v2144_v7 = vadd.f32 %v5216_v9, %v1910_v49 }
 0x180   : > { %v5121_v41 = vpop.f32.mrf.mxu0  ;;  %v2681_v6 = vadd.f32 %v2650_v34, %v2558_v5  ;;  %v2683_v46 = vadd.f32 %v4082_v35, %v2560_v52  ;;  %v1786_v34 = vadd.f32 %v5078_v56, %v1528_v45  ;;  %v1911_v56 = vadd.f32 %v5090_v31, %v1788_v14  ;;  %v5222_v5 = vld [vmem:[#allocation8_spill] sm:$0xff] }
 0x181   : > { %v4093_v40 = vpop.f32.mrf.mxu1  ;;  %v2301_v44 = vadd.f32 %v2272_v19, %v2139_v63  ;;  %v2142_v39 = vadd.f32 %v5086_v50, %v1908_v58  ;;  %v2306_v60 = vadd.f32 %v5218_v37, %v2144_v7 }
 0x182   : > { %v5128_v2 = vpop.f32.mrf.mxu0  ;;  %v2915_v13 = vadd.f32 %v2884_v3, %v2681_v6  ;;  %v2917_v55 = vadd.f32 %v4092_v43, %v2683_v46  ;;  %v2918_v4 = vadd.f32 %v4093_v40, %v2684_v16  ;;  %v5219_v40 = vld [vmem:[#allocation3_spill] sm:$0xff] }
 0x183   : > { %v2887_v24 = vpop.f32.mrf.mxu1  ;;  %v2559_v53 = vadd.f32 %v2530_v38, %v2301_v44  ;;  %v1909_v38 = vadd.f32 %v5094_v33, %v1786_v34  ;;  %v2304_v43 = vadd.f32 %v5102_v59, %v2142_v39 }
 0x184   : > { %v5134_v61 = vpop.f32.mrf.mxu0 }
 0x185   : > { %v2682_v19 = vadd.f32 %v2653_v25, %v2559_v53  ;;  %v2143_v33 = vadd.f32 %v5217_v22, %v1909_v38  ;;  %v2562_v59 = vadd.f32 %v5221_v57, %v2304_v43  ;;  %v2564_v53 = vadd.f32 %v5223_v15, %v2306_v60 }
 0x186   : > { %v5140_v30 = vpop.f32.mrf.mxu0 }
 0x187   : > { %v5126_v42 = vpop.f32.mrf.mxu1  ;;  %v2916_v3 = vadd.f32 %v2887_v24, %v2682_v19  ;;  %v2145_v24 = vadd.f32 %v5219_v40, %v1911_v56  ;;  %v2305_v31 = vadd.f32 %v5220_v11, %v2143_v33  ;;  %v2685_v6 = vadd.f32 %v5128_v2, %v2562_v59 }
 0x189   : > { %v5130_v20 = vpop.f32.mrf.mxu1  ;;  %v2307_v52 = vadd.f32 %v5222_v5, %v2145_v24 }
 0x18a   : > { %v2919_v2 = vadd.f32 %v5130_v20, %v2685_v6 }
 0x18b   : > { %v5132_v18 = vpop.f32.mrf.mxu1 }
 0x18d   : > { %v5138_v29 = vpop.f32.mrf.mxu1 }
 0x192   : > { %v4112_v26 = vpop.f32.mrf.mxu1 }
 0x193   : > { %v4102_v27 = vpop.f32.mrf.mxu0 }
 0x194   : > { %v3304_v23 = vpop.f32.mrf.mxu1  ;;  %v3079_v35 = vadd.f32 %v4102_v27, %v2917_v55 }
 0x195   : > { %v3046_v48 = vpop.f32.mrf.mxu0 }
 0x196   : > { %v3077_v36 = vadd.f32 %v3046_v48, %v2915_v13  ;;  %v4113_v12 = vpop.f32.mrf.mxu1  ;;  %v3337_v10 = vadd.f32 %v4112_v26, %v3079_v35  ;;  %v5224_v26 = vld [vmem:[#allocation11_spill] sm:$0xff]  ;;  %v5225_v13 = vld [vmem:[#allocation9_spill] sm:$0xff] }
 0x197   : > { %v4103_v17 = vpop.f32.mrf.mxu0  ;;  %v2563_v54 = vadd.f32 %v5224_v26, %v2305_v31  ;;  %v2565_v34 = vadd.f32 %v5225_v13, %v2307_v52 }
 0x198   : > { %v3335_v25 = vadd.f32 %v3304_v23, %v3077_v36  ;;  %v3080_v8 = vadd.f32 %v4103_v17, %v2918_v4  ;;  %v3307_v32 = vpop.f32.mrf.mxu1  ;;  %v3360_v45 = vmul.f32 %v3337_v10, %v3337_v10  ;;  %v2687_v23 = vadd.f32 %v5121_v41, %v2564_v53 }
 0x199   : > { %v3049_v0 = vpop.f32.mrf.mxu0  ;;  %v2686_v48 = vadd.f32 %v5140_v30, %v2563_v54  ;;  %v2688_v36 = vadd.f32 %v5134_v61, %v2565_v34 }
 0x19a   : > { %v3078_v62 = vadd.f32 %v3049_v0, %v2916_v3  ;;  %3380 = vxpose.xlu0.b32.start [1/8] (short) (narrow) %v3335_v25, 8  ;;  %v3358_v21 = vmul.f32 %v3335_v25, %v3335_v25  ;;  %v3338_v63 = vadd.f32 %v4113_v12, %v3080_v8  ;;  %v2921_v39 = vadd.f32 %v5126_v42, %v2687_v23 }
 0x19b   : > { %v4106_v50 = vpop.f32.mrf.mxu0  ;;  %v2920_v12 = vadd.f32 %v5138_v29, %v2686_v48  ;;  %v2922_v41 = vadd.f32 %v5132_v18, %v2688_v36 }
 0x19c   : > { %v3336_v51 = vadd.f32 %v3307_v32, %v3078_v62  ;;  %v3361_v58 = vmul.f32 %v3338_v63, %v3338_v63  ;;  %v3083_v35 = vadd.f32 %v4106_v50, %v2921_v39 }
 0x19d   : > { %v3062_v44 = vpop.f32.mrf.mxu0 }
 0x19e   : > { %v3343_v47 = vadd.f32 %v3336_v51, %v3335_v25  ;;  %v3359_v28 = vmul.f32 %v3336_v51, %v3336_v51  ;;  %3381 = vxpose.xlu0.b32.cont [2/8] (short) (narrow) %v3336_v51, 8  ;;  %v3081_v49 = vadd.f32 %v3062_v44, %v2919_v2 }
 0x19f   : > { %v4107_v27 = vpop.f32.mrf.mxu0 }
 0x1a0   : > { %v3366_v1 = vadd.f32 %v3359_v28, %v3358_v21  ;;  %v3344_v46 = vadd.f32 %v3343_v47, %v3337_v10  ;;  %v3084_v3 = vadd.f32 %v4107_v27, %v2922_v41 }
 0x1a1   : > { %v3065_v38 = vpop.f32.mrf.mxu0 }
 0x1a2   : > { %v3345_v16 = vadd.f32 %v3344_v46, %v3338_v63  ;;  %v3367_v19 = vadd.f32 %v3366_v1, %v3360_v45  ;;  %3382 = vxpose.xlu0.b32.cont [3/8] (short) (narrow) %v3337_v10, 8  ;;  %v3082_v4 = vadd.f32 %v3065_v38, %v2920_v12 }
 0x1a4   : > { %v3368_v55 = vadd.f32 %v3367_v19, %v3361_v58 }
 0x1a6   : > { %v4116_v14 = vpop.f32.mrf.mxu1  ;;  %3383 = vxpose.xlu0.b32.cont [4/8] (short) (narrow) %v3338_v63, 8 }
 0x1a7   : > { %v3341_v43 = vadd.f32 %v4116_v14, %v3083_v35 }
 0x1a8   : > { %v3320_v17 = vpop.f32.mrf.mxu1 }
 0x1a9   : > { %v3339_v25 = vadd.f32 %v3320_v17, %v3081_v49  ;;  %v3364_v29 = vmul.f32 %v3341_v43, %v3341_v43 }
 0x1aa   : > { %v4117_v30 = vpop.f32.mrf.mxu1 }
 0x1ab   : > { %v3346_v20 = vadd.f32 %v3345_v16, %v3339_v25  ;;  %v3362_v56 = vmul.f32 %v3339_v25, %v3339_v25  ;;  %3384 = vxpose.xlu0.b32.cont [5/8] (short) (narrow) %v3339_v25, 8  ;;  %v3342_v62 = vadd.f32 %v4117_v30, %v3084_v3 }
 0x1ac   : > { %v3323_v61 = vpop.f32.mrf.mxu1 }
 0x1ad   : > { %v3369_v0 = vadd.f32 %v3368_v55, %v3362_v56  ;;  %v3340_v8 = vadd.f32 %v3323_v61, %v3082_v4  ;;  %v3365_v18 = vmul.f32 %v3342_v62, %v3342_v62 }
 0x1af   : > { %v3347_v9 = vadd.f32 %v3346_v20, %v3340_v8  ;;  %v3363_v42 = vmul.f32 %v3340_v8, %v3340_v8  ;;  %3385 = vxpose.xlu0.b32.cont [6/8] (short) (narrow) %v3340_v8, 8 }
 0x1b1   : > { %v3348_v7 = vadd.f32 %v3347_v9, %v3341_v43  ;;  %v3370_v22 = vadd.f32 %v3369_v0, %v3363_v42 }
 0x1b3   : > { %v3349_v33 = vadd.f32 %v3348_v7, %v3342_v62  ;;  %v3371_v32 = vadd.f32 %v3370_v22, %v3364_v29  ;;  %3386 = vxpose.xlu0.b32.cont [7/8] (short) (narrow) %v3341_v43, 8 }
 0x1b5   : > { %v3350_v50 = vrot.slane %v3349_v33, 4  ;;  %v3372_v10 = vadd.f32 %v3371_v32, %v3365_v18 }
 0x1b7   : > { %v3351_v51 = vadd.f32 %v3350_v50, %v3349_v33  ;;  %v3373_v37 = vrot.slane %v3372_v10, 4  ;;  %3387 = vxpose.xlu0.b32.end [8/8] (short) (narrow) %v3342_v62, 8 }
 0x1b9   : > { %v3352_v60 = vrot.slane %v3351_v51, 2  ;;  %v3374_v40 = vadd.f32 %v3373_v37, %v3372_v10 }
 0x1bb   : > { %v3353_v24 = vadd.f32 %v3352_v60, %v3351_v51  ;;  %v3375_v11 = vrot.slane %v3374_v40, 2 }
 0x1bd   : > { %v3354_v31 = vrot.slane %v3353_v24, 1  ;;  %v3376_v57 = vadd.f32 %v3375_v11, %v3374_v40 }
 0x1bf   : > { %v3355_v59 = vadd.f32 %v3354_v31, %v3353_v24  ;;  %v3377_v21 = vrot.slane %v3376_v57, 1 }
 0x1c1   : > { %3357 = vst.msk [vmem:[%s243_s9] sm:$0x1] %vm3356_vm10, %v3355_v59  ;;  %v3378_v63 = vadd.f32 %v3377_v21, %v3376_v57 }
 0x1c3   : > { %3379 = vst.msk [vmem:[%s248_s12] sm:$0x1] %vm3356_vm10, %v3378_v63 }
 0x217   : > { %v3396_v47 = vpop.trf.xlu0 }
 0x218   : > { %v3412_v28 = vpack.c.bf16 %v3396_v47, %v3396_v47 }
 0x21a   : > { %3414 = vst.msk [vmem:[%s239_s20] sm:$0xf] %vm3413_vm11, %v3412_v28 }
 0x21b PF: > { %s15_s17 = sadd.s32 1, %s4198_s17   ;;  %s5226_s15 = smov %s4194_s16 }
 0x21c   : > { %p12_p5 = scmp.ge.s32.totalorder %s15_s17, 4   ;;  %s5227_s16 = smov %s5229_s18 }
 0x21e   :  { %14 = sbr.rel (!%p12_p5) target bundleno = 2 (0x2), region = 100 }

</bundles_post_ra>
